<compile_context>
chip_gen: v7x
topology: tpu7x:2x2x1
jax: 0.10.0
libtpu: 0.0.40
codegen_flags: <defaults>
</compile_context>

<pallas_src>
import functools

import jax
import jax.numpy as jnp
from jax.experimental import pallas as pl
from jax.experimental.pallas import tpu as pltpu


_TAPS9 = tuple((dh, dw) for dh in range(3) for dw in range(3))
_TAPS4 = ((0, 0), (0, 1), (1, 0), (1, 1))
_VMEM_LIMIT = 32 * 1024 * 1024   # conservative; also within v7x's 64 MiB physical VMEM


# ----------------------------- Pallas kernels ------------------------------ #

def _conv_bn_relu_pad_kernel(x_ref, w_ref, shift_ref, o_ref, *, taps, ho, wo):
    """Per-tap-matmul conv (3x3 or space-to-depth 2x2) + folded-BN shift + ReLU.

    x_ref:     (nb, Hi, Wi, Cin)       bf16, spatially padded input tile
    w_ref:     (T,  Cin, Cout)         bf16 per-tap weights, BN scale folded in
    shift_ref: (1, Cout)               f32 folded BN shift
    o_ref:     (nb, ho+2, wo+2, Cout)  bf16, written with a zero halo ring so the
                                       following 3x3 conv can consume it directly.
    """
    nb, _, _, cin = x_ref.shape
    cout = o_ref.shape[-1]
    m = nb * ho * wo

    x = x_ref[...]
    acc = jnp.zeros((m, cout), jnp.float32)
    for t, (dh, dw) in enumerate(taps):           # static unroll: 4 or 9 MXU matmuls
        xt = x[:, dh:dh + ho, dw:dw + wo, :].reshape(m, cin)
        acc = acc + jnp.dot(xt, w_ref[t], preferred_element_type=jnp.float32)
    acc = jnp.maximum(acc + shift_ref[...], 0.0)

    y = acc.astype(o_ref.dtype).reshape(nb, ho, wo, cout)
    o_ref[:, 1:ho + 1, 1:wo + 1, :] = y           # interior
    zrow = jnp.zeros((nb, 1, wo + 2, cout), o_ref.dtype)
    zcol = jnp.zeros((nb, ho + 2, 1, cout), o_ref.dtype)
    o_ref[:, 0:1, :, :] = zrow                    # zero halo ring
    o_ref[:, ho + 1:ho + 2, :, :] = zrow
    o_ref[:, :, 0:1, :] = zcol
    o_ref[:, :, wo + 1:wo + 2, :] = zcol


def _conv2_bn_res_relu_kernel(h_ref, w_ref, shift_ref, xs_ref, *rest, ho, wo, proj):
    """conv2 (3x3, stride 1) + BN + fused shortcut + residual add + ReLU.

    h_ref:   (nb, ho+2, wo+2, C)  bf16 zero-haloed conv1 output
    w_ref:   (9, C, C)            bf16, BN scale folded in
    shift:   (1, C)               f32
    xs_ref:  (nb, ho, wo, Cin)    bf16 (pre-strided) input tile for the shortcut
    if proj: wd_ref (Cin, C) bf16 and shiftd_ref (1, C) f32 follow (1x1 conv + BN),
             else the residual is the identity add of xs.
    o_ref:   (C, nb*ho*wo)        f32, lane-dense transposed output block
    """
    if proj:
        wd_ref, shiftd_ref, o_ref = rest
    else:
        (o_ref,) = rest
    nb = h_ref.shape[0]
    c = h_ref.shape[-1]
    m = nb * ho * wo

    h = h_ref[...]
    acc = jnp.zeros((m, c), jnp.float32)
    for t, (dh, dw) in enumerate(_TAPS9):         # static unroll: 9 MXU matmuls
        ht = h[:, dh:dh + ho, dw:dw + wo, :].reshape(m, c)
        acc = acc + jnp.dot(ht, w_ref[t], preferred_element_type=jnp.float32)
    acc = acc + shift_ref[...]

    xs = xs_ref[...].reshape(m, xs_ref.shape[-1])
    if proj:                                      # fused 1x1 conv + BN shortcut
        acc = acc + jnp.dot(xs, wd_ref[...], preferred_element_type=jnp.float32)
        acc = acc + shiftd_ref[...]
    else:                                         # identity shortcut
        acc = acc + xs.astype(jnp.float32)

    out = jnp.maximum(acc, 0.0).astype(o_ref.dtype)
    o_ref[...] = out.T                            # (C, m): lane dim m >= 128, dense stores


# ------------------------- wrappers / weight prep --------------------------- #

def _pick_nb(n, ho, wo, target_m=1024):
    """Largest batch-tile nb | n with nb*ho*wo <= target_m (lane-safe for the output)."""
    cands = [d for d in range(1, n + 1)
             if n % d == 0 and (d == n or (d * ho * wo) % 128 == 0)]
    fits = [d for d in cands if d * ho * wo <= max(target_m, ho * wo)]
    return max(fits) if fits else min(cands)


def fold_bn(gamma, beta, mean, var, eps=1e-5):
    scale = gamma / jnp.sqrt(var + eps)
    return scale, beta - mean * scale


def _w3x3_taps(w_oihw, scale):
    """(Cout, Cin, 3, 3) -> (9, Cin, Cout) per-tap bf16 weights with BN scale folded."""
    cout, cin = w_oihw.shape[:2]
    w = jnp.transpose(w_oihw, (2, 3, 1, 0)).reshape(9, cin, cout)
    return (w * scale[None, None, :]).astype(jnp.bfloat16)


def _w3x3_s2d_taps(w_oihw, scale):
    """Stride-2 3x3 conv == 4-tap stride-1 conv over the space-to-depth input.

    Returns (4, 4*Cin, Cout) bf16 (BN scale folded); tap (qh, qw) channel order is
    (ph, pw, ci), matching the wrapper's space-to-depth channel packing.
    """
    cout, cin = w_oihw.shape[:2]
    w = jnp.transpose(w_oihw, (2, 3, 1, 0))                        # (3, 3, Cin, Cout)
    wz = jnp.zeros((4, 4, cin, cout), w.dtype).at[:3, :3].set(w)
    taps = [wz[2 * qh:2 * qh + 2, 2 * qw:2 * qw + 2].reshape(4 * cin, cout)
            for qh, qw in _TAPS4]
    wt = jnp.stack(taps, axis=0)                                   # (4, 4*Cin, Cout)
    return (wt * scale[None, None, :]).astype(jnp.bfloat16)


def _conv1_bn_relu(xin, wtaps, shift, taps, ho, wo, cout, nb):
    n, hi, wi, ci = xin.shape
    kern = functools.partial(_conv_bn_relu_pad_kernel, taps=taps, ho=ho, wo=wo)
    return pl.pallas_call(
        kern,
        out_shape=jax.ShapeDtypeStruct((n, ho + 2, wo + 2, cout), jnp.bfloat16),
        grid=(n // nb,),
        in_specs=[
            pl.BlockSpec((nb, hi, wi, ci), lambda i: (i, 0, 0, 0)),
            pl.BlockSpec(wtaps.shape, lambda i: (0, 0, 0)),
            pl.BlockSpec((1, cout), lambda i: (0, 0)),
        ],
        out_specs=pl.BlockSpec((nb, ho + 2, wo + 2, cout), lambda i: (i, 0, 0, 0)),
        compiler_params=pltpu.CompilerParams(
            dimension_semantics=("parallel",), vmem_limit_bytes=_VMEM_LIMIT),
    )(xin, wtaps, shift)


def _conv2_bn_res_relu(h1p, w2taps, shift2, xs, wd, shiftd, ho, wo, cout, nb):
    n = h1p.shape[0]
    m = n * ho * wo
    proj = wd is not None
    in_specs = [
        pl.BlockSpec((nb, ho + 2, wo + 2, cout), lambda i: (i, 0, 0, 0)),
        pl.BlockSpec(w2taps.shape, lambda i: (0, 0, 0)),
        pl.BlockSpec((1, cout), lambda i: (0, 0)),
        pl.BlockSpec((nb, ho, wo, xs.shape[-1]), lambda i: (i, 0, 0, 0)),
    ]
    args = [h1p, w2taps, shift2, xs]
    if proj:
        in_specs += [pl.BlockSpec(wd.shape, lambda i: (0, 0)),
                     pl.BlockSpec((1, cout), lambda i: (0, 0))]
        args += [wd, shiftd]
    kern = functools.partial(_conv2_bn_res_relu_kernel, ho=ho, wo=wo, proj=proj)
    return pl.pallas_call(
        kern,
        out_shape=jax.ShapeDtypeStruct((cout, m), jnp.float32),
        grid=(n // nb,),
        in_specs=in_specs,
        out_specs=pl.BlockSpec((cout, nb * ho * wo), lambda i: (0, i)),
        compiler_params=pltpu.CompilerParams(
            dimension_semantics=("parallel",), vmem_limit_bytes=_VMEM_LIMIT),
    )(*args)


def qbasicblock_forward(x_nchw, params, stride, inplanes, planes):
    """Full QBasicBlock4Cifar forward (weight_bit=2 => select/addZeroS/chunk are no-ops)."""
    assert stride in (1, 2)
    x = jnp.transpose(x_nchw, (0, 2, 3, 1)).astype(jnp.float32)      # NCHW -> NHWC
    n, h, w, _ = x.shape
    ho, wo = h // stride, w // stride
    nb = _pick_nb(n, ho, wo)

    # conv1 (3x3, stride) + bn1 + relu, written into a zero-haloed padded buffer.
    s1, b1 = fold_bn(*params["bn1"])
    xp = jnp.pad(x, ((0, 0), (1, 1), (1, 1), (0, 0)))
    if stride == 2:
        assert h % 2 == 0 and w % 2 == 0
        hh, wh = (h + 2) // 2, (w + 2) // 2
        xin = (xp.reshape(n, hh, 2, wh, 2, inplanes)
                 .transpose(0, 1, 3, 2, 4, 5)
                 .reshape(n, hh, wh, 4 * inplanes))                  # space-to-depth
        w1taps, taps1 = _w3x3_s2d_taps(params["w1"], s1), _TAPS4
    else:
        xin = xp
        w1taps, taps1 = _w3x3_taps(params["w1"], s1), _TAPS9
    h1p = _conv1_bn_relu(xin.astype(jnp.bfloat16), w1taps,
                         b1.reshape(1, planes).astype(jnp.float32),
                         taps1, ho, wo, planes, nb)

    # conv2 (3x3, stride 1) + bn2 + fused shortcut + residual add + relu.
    s2, b2 = fold_bn(*params["bn2"])
    w2taps = _w3x3_taps(params["w2"], s2)
    if stride != 1 or inplanes != planes:
        sd, bd = fold_bn(*params["bnd"])
        wd = (params["wd"].reshape(planes, inplanes).T * sd[None, :]).astype(jnp.bfloat16)
        shiftd = bd.reshape(1, planes).astype(jnp.float32)
        xs = x[:, ::stride, ::stride, :].astype(jnp.bfloat16)
    else:
        wd, shiftd = None, None
        xs = x.astype(jnp.bfloat16)
    out_t = _conv2_bn_res_relu(h1p, w2taps, b2.reshape(1, planes).astype(jnp.float32),
                               xs, wd, shiftd, ho, wo, planes, nb)   # (planes, n*ho*wo)

    return out_t.reshape(planes, n, ho, wo).transpose(1, 0, 2, 3)    # NCHW


# --------------------------- pure-JAX reference ----------------------------- #

def _conv_ref(x_nchw, w_oihw, stride, pad):
    return jax.lax.conv_general_dilated(
        x_nchw, w_oihw, (stride, stride), ((pad, pad), (pad, pad)),
        dimension_numbers=("NCHW", "OIHW", "NCHW"))


def _bn_ref(x, gamma, beta, mean, var, eps=1e-5):
    s = gamma / jnp.sqrt(var + eps)
    return x * s[None, :, None, None] + (beta - mean * s)[None, :, None, None]


def reference_forward(x, params, stride, inplanes, planes):
    out = jax.nn.relu(_bn_ref(_conv_ref(x, params["w1"], stride, 1), *params["bn1"]))
    out = _bn_ref(_conv_ref(out, params["w2"], 1, 1), *params["bn2"])
    if stride != 1 or inplanes != planes:
        sc = _bn_ref(_conv_ref(x, params["wd"], stride, 0), *params["bnd"])
    else:
        sc = x
    return jax.nn.relu(out + sc)


# --------------------------------- main ------------------------------------- #

if __name__ == "__main__":
    key = jax.random.PRNGKey(0)
    ks = jax.random.split(key, 16)

    def bn_params(k, c):
        k1, k2, k3, k4 = jax.random.split(k, 4)
        gamma = 1.0 + 0.1 * jax.random.normal(k1, (c,), jnp.float32)
        beta = 0.1 * jax.random.normal(k2, (c,), jnp.float32)
        mean = 0.1 * jax.random.normal(k3, (c,), jnp.float32)
        var = 0.5 + 0.5 * jnp.abs(jax.random.normal(k4, (c,), jnp.float32))
        return (gamma, beta, mean, var)

    fwd = jax.jit(qbasicblock_forward, static_argnums=(2, 3, 4))

    # Test 1: stride=2 downsampling block (exercises s2d conv1 + fused 1x1 projection).
    N, inplanes, planes, H, W, stride = 2, 4, 8, 16, 16, 2
    params = {
        "w1": 0.1 * jax.random.normal(ks[0], (planes, inplanes, 3, 3), jnp.float32),
        "bn1": bn_params(ks[1], planes),
        "w2": 0.1 * jax.random.normal(ks[2], (planes, planes, 3, 3), jnp.float32),
        "bn2": bn_params(ks[3], planes),
        "wd": 0.1 * jax.random.normal(ks[4], (planes, inplanes, 1, 1), jnp.float32),
        "bnd": bn_params(ks[5], planes),
    }
    x = jax.random.normal(ks[6], (N, inplanes, H, W), jnp.float32)
    out = jax.block_until_ready(fwd(x, params, stride, inplanes, planes))
    ref = jax.block_until_ready(reference_forward(x, params, stride, inplanes, planes))
    assert out.shape == (N, planes, H // stride, W // stride), out.shape
    # bf16 matmul operands vs f32 reference -> loose tolerance.
    assert jnp.allclose(out, ref, atol=5e-2, rtol=5e-2), float(jnp.max(jnp.abs(out - ref)))

    # Test 2: stride=1 identity-shortcut block.
    N2, c2, H2, W2 = 2, 8, 8, 8
    params2 = {
        "w1": 0.1 * jax.random.normal(ks[7], (c2, c2, 3, 3), jnp.float32),
        "bn1": bn_params(ks[8], c2),
        "w2": 0.1 * jax.random.normal(ks[9], (c2, c2, 3, 3), jnp.float32),
        "bn2": bn_params(ks[10], c2),
    }
    x2 = jax.random.normal(ks[11], (N2, c2, H2, W2), jnp.float32)
    out2 = jax.block_until_ready(fwd(x2, params2, 1, c2, c2))
    ref2 = jax.block_until_ready(reference_forward(x2, params2, 1, c2, c2))
    assert out2.shape == (N2, c2, H2, W2), out2.shape
    assert jnp.allclose(out2, ref2, atol=5e-2, rtol=5e-2), float(jnp.max(jnp.abs(out2 - ref2)))

    print("KERNEL_OK")
</pallas_src>

<mosaic_0001>
module attributes {stable_mosaic.version = 11 : i64} {
  func.func @_conv_bn_relu_pad_kernel(%arg0: i32, %arg1: memref<2x9x9x16xbf16, #tpu.memory_space<vmem>>, %arg2: memref<4x16x8xbf16, #tpu.memory_space<vmem>>, %arg3: memref<1x8xf32, #tpu.memory_space<vmem>>, %arg4: memref<2x10x10x8xbf16, #tpu.memory_space<vmem>>) attributes {dimension_semantics = [#tpu.dimension_semantics<parallel>], iteration_bounds = array<i64: 1>, scalar_prefetch = 0 : i64, scratch_operands = 0 : i64, tpu.core_type = #tpu.core_type<tc>, window_params = [{transform_indices = @transform_0, window_bounds = array<i64: 2, 9, 9, 16>}, {pipeline_mode = #tpu.pipeline_mode<synchronous>, transform_indices = @transform_1, window_bounds = array<i64: 4, 16, 8>}, {pipeline_mode = #tpu.pipeline_mode<synchronous>, transform_indices = @transform_2, window_bounds = array<i64: 1, 8>}, {transform_indices = @transform_3, window_bounds = array<i64: 2, 10, 10, 8>}]} {
    %c0 = arith.constant 0 : index
    %c0_0 = arith.constant 0 : index
    %c0_1 = arith.constant 0 : index
    %c0_2 = arith.constant 0 : index
    %0 = vector.load %arg1[%c0, %c0_0, %c0_1, %c0_2] : memref<2x9x9x16xbf16, #tpu.memory_space<vmem>>, vector<2x9x9x16xbf16>
    %cst = arith.constant 0.000000e+00 : f32
    %1 = vector.broadcast %cst : f32 to vector<128x8xf32>
    %2 = vector.extract_strided_slice %0 {offsets = [0, 0, 0, 0], sizes = [2, 8, 8, 16], strides = [1, 1, 1, 1]} : vector<2x9x9x16xbf16> to vector<2x8x8x16xbf16>
    %3 = vector.shape_cast %2 : vector<2x8x8x16xbf16> to vector<128x16xbf16>
    %c0_3 = arith.constant 0 : index
    %c0_4 = arith.constant 0 : index
    %c0_5 = arith.constant 0 : index
    %4 = vector.load %arg2[%c0_3, %c0_4, %c0_5] : memref<4x16x8xbf16, #tpu.memory_space<vmem>>, vector<1x16x8xbf16>
    %5 = vector.shape_cast %4 : vector<1x16x8xbf16> to vector<16x8xbf16>
    %cst_6 = arith.constant dense<0.000000e+00> : vector<128x8xf32>
    %6 = tpu.matmul %3, %5, %cst_6 {dimension_numbers = #tpu.dot_dimension_numbers<[1], [0], [0], [1], [0, 0, 1, 1], [], []>} : vector<128x16xbf16>, vector<16x8xbf16>, vector<128x8xf32> -> vector<128x8xf32>
    %7 = arith.addf %1, %6 : vector<128x8xf32>
    %8 = vector.extract_strided_slice %0 {offsets = [0, 0, 1, 0], sizes = [2, 8, 8, 16], strides = [1, 1, 1, 1]} : vector<2x9x9x16xbf16> to vector<2x8x8x16xbf16>
    %9 = vector.shape_cast %8 : vector<2x8x8x16xbf16> to vector<128x16xbf16>
    %c1 = arith.constant 1 : index
    %c0_7 = arith.constant 0 : index
    %c0_8 = arith.constant 0 : index
    %10 = vector.load %arg2[%c1, %c0_7, %c0_8] : memref<4x16x8xbf16, #tpu.memory_space<vmem>>, vector<1x16x8xbf16>
    %11 = vector.shape_cast %10 : vector<1x16x8xbf16> to vector<16x8xbf16>
    %cst_9 = arith.constant dense<0.000000e+00> : vector<128x8xf32>
    %12 = tpu.matmul %9, %11, %cst_9 {dimension_numbers = #tpu.dot_dimension_numbers<[1], [0], [0], [1], [0, 0, 1, 1], [], []>} : vector<128x16xbf16>, vector<16x8xbf16>, vector<128x8xf32> -> vector<128x8xf32>
    %13 = arith.addf %7, %12 : vector<128x8xf32>
    %14 = vector.extract_strided_slice %0 {offsets = [0, 1, 0, 0], sizes = [2, 8, 8, 16], strides = [1, 1, 1, 1]} : vector<2x9x9x16xbf16> to vector<2x8x8x16xbf16>
    %15 = vector.shape_cast %14 : vector<2x8x8x16xbf16> to vector<128x16xbf16>
    %c2 = arith.constant 2 : index
    %c0_10 = arith.constant 0 : index
    %c0_11 = arith.constant 0 : index
    %16 = vector.load %arg2[%c2, %c0_10, %c0_11] : memref<4x16x8xbf16, #tpu.memory_space<vmem>>, vector<1x16x8xbf16>
    %17 = vector.shape_cast %16 : vector<1x16x8xbf16> to vector<16x8xbf16>
    %cst_12 = arith.constant dense<0.000000e+00> : vector<128x8xf32>
    %18 = tpu.matmul %15, %17, %cst_12 {dimension_numbers = #tpu.dot_dimension_numbers<[1], [0], [0], [1], [0, 0, 1, 1], [], []>} : vector<128x16xbf16>, vector<16x8xbf16>, vector<128x8xf32> -> vector<128x8xf32>
    %19 = arith.addf %13, %18 : vector<128x8xf32>
    %20 = vector.extract_strided_slice %0 {offsets = [0, 1, 1, 0], sizes = [2, 8, 8, 16], strides = [1, 1, 1, 1]} : vector<2x9x9x16xbf16> to vector<2x8x8x16xbf16>
    %21 = vector.shape_cast %20 : vector<2x8x8x16xbf16> to vector<128x16xbf16>
    %c3 = arith.constant 3 : index
    %c0_13 = arith.constant 0 : index
    %c0_14 = arith.constant 0 : index
    %22 = vector.load %arg2[%c3, %c0_13, %c0_14] : memref<4x16x8xbf16, #tpu.memory_space<vmem>>, vector<1x16x8xbf16>
    %23 = vector.shape_cast %22 : vector<1x16x8xbf16> to vector<16x8xbf16>
    %cst_15 = arith.constant dense<0.000000e+00> : vector<128x8xf32>
    %24 = tpu.matmul %21, %23, %cst_15 {dimension_numbers = #tpu.dot_dimension_numbers<[1], [0], [0], [1], [0, 0, 1, 1], [], []>} : vector<128x16xbf16>, vector<16x8xbf16>, vector<128x8xf32> -> vector<128x8xf32>
    %25 = arith.addf %19, %24 : vector<128x8xf32>
    %c0_16 = arith.constant 0 : index
    %c0_17 = arith.constant 0 : index
    %26 = vector.load %arg3[%c0_16, %c0_17] : memref<1x8xf32, #tpu.memory_space<vmem>>, vector<1x8xf32>
    %27 = vector.broadcast %26 : vector<1x8xf32> to vector<128x8xf32>
    %28 = arith.addf %25, %27 : vector<128x8xf32>
    %cst_18 = arith.constant 0.000000e+00 : f32
    %29 = vector.broadcast %cst_18 : f32 to vector<128x8xf32>
    %30 = arith.maximumf %28, %29 : vector<128x8xf32>
    %31 = arith.truncf %30 : vector<128x8xf32> to vector<128x8xbf16>
    %32 = vector.shape_cast %31 : vector<128x8xbf16> to vector<2x8x8x8xbf16>
    %c0_19 = arith.constant 0 : index
    %c1_20 = arith.constant 1 : index
    %c1_21 = arith.constant 1 : index
    %c0_22 = arith.constant 0 : index
    %33 = vector.load %arg4[%c0_19, %c1_20, %c1_21, %c0_22] : memref<2x10x10x8xbf16, #tpu.memory_space<vmem>>, vector<2x8x8x8xbf16>
    tpu.vector_store %arg4[%c0_19, %c1_20, %c1_21, %c0_22], %32 {strides = array<i32>} : memref<2x10x10x8xbf16, #tpu.memory_space<vmem>>, vector<2x8x8x8xbf16>,
    %cst_23 = arith.constant 0.000000e+00 : bf16
    %34 = vector.broadcast %cst_23 : bf16 to vector<2x1x10x8xbf16>
    %cst_24 = arith.constant 0.000000e+00 : bf16
    %35 = vector.broadcast %cst_24 : bf16 to vector<2x10x1x8xbf16>
    %c0_25 = arith.constant 0 : index
    %c0_26 = arith.constant 0 : index
    %c0_27 = arith.constant 0 : index
    %c0_28 = arith.constant 0 : index
    %36 = vector.load %arg4[%c0_25, %c0_26, %c0_27, %c0_28] : memref<2x10x10x8xbf16, #tpu.memory_space<vmem>>, vector<2x1x10x8xbf16>
    tpu.vector_store %arg4[%c0_25, %c0_26, %c0_27, %c0_28], %34 {strides = array<i32>} : memref<2x10x10x8xbf16, #tpu.memory_space<vmem>>, vector<2x1x10x8xbf16>,
    %c0_29 = arith.constant 0 : index
    %c9 = arith.constant 9 : index
    %c0_30 = arith.constant 0 : index
    %c0_31 = arith.constant 0 : index
    %37 = vector.load %arg4[%c0_29, %c9, %c0_30, %c0_31] : memref<2x10x10x8xbf16, #tpu.memory_space<vmem>>, vector<2x1x10x8xbf16>
    tpu.vector_store %arg4[%c0_29, %c9, %c0_30, %c0_31], %34 {strides = array<i32>} : memref<2x10x10x8xbf16, #tpu.memory_space<vmem>>, vector<2x1x10x8xbf16>,
    %c0_32 = arith.constant 0 : index
    %c0_33 = arith.constant 0 : index
    %c0_34 = arith.constant 0 : index
    %c0_35 = arith.constant 0 : index
    %38 = vector.load %arg4[%c0_32, %c0_33, %c0_34, %c0_35] : memref<2x10x10x8xbf16, #tpu.memory_space<vmem>>, vector<2x10x1x8xbf16>
    tpu.vector_store %arg4[%c0_32, %c0_33, %c0_34, %c0_35], %35 {strides = array<i32>} : memref<2x10x10x8xbf16, #tpu.memory_space<vmem>>, vector<2x10x1x8xbf16>,
    %c0_36 = arith.constant 0 : index
    %c0_37 = arith.constant 0 : index
    %c9_38 = arith.constant 9 : index
    %c0_39 = arith.constant 0 : index
    %39 = vector.load %arg4[%c0_36, %c0_37, %c9_38, %c0_39] : memref<2x10x10x8xbf16, #tpu.memory_space<vmem>>, vector<2x10x1x8xbf16>
    tpu.vector_store %arg4[%c0_36, %c0_37, %c9_38, %c0_39], %35 {strides = array<i32>} : memref<2x10x10x8xbf16, #tpu.memory_space<vmem>>, vector<2x10x1x8xbf16>,
    return
  }
  func.func @transform_0(%arg0: i32) -> (i32, i32, i32, i32) {
    %c0_i32 = arith.constant 0 : i32
    %c0_i32_0 = arith.constant 0 : i32
    %c0_i32_1 = arith.constant 0 : i32
    %c0_i32_2 = arith.constant 0 : i32
    return %arg0, %c0_i32, %c0_i32_0, %c0_i32_1 : i32, i32, i32, i32
  }
  func.func @transform_1(%arg0: i32) -> (i32, i32, i32) {
    %c0_i32 = arith.constant 0 : i32
    %c0_i32_0 = arith.constant 0 : i32
    %c0_i32_1 = arith.constant 0 : i32
    %c0_i32_2 = arith.constant 0 : i32
    return %c0_i32, %c0_i32_0, %c0_i32_1 : i32, i32, i32
  }
  func.func @transform_2(%arg0: i32) -> (i32, i32) {
    %c0_i32 = arith.constant 0 : i32
    %c0_i32_0 = arith.constant 0 : i32
    %c0_i32_1 = arith.constant 0 : i32
    return %c0_i32, %c0_i32_0 : i32, i32
  }
  func.func @transform_3(%arg0: i32) -> (i32, i32, i32, i32) {
    %c0_i32 = arith.constant 0 : i32
    %c0_i32_0 = arith.constant 0 : i32
    %c0_i32_1 = arith.constant 0 : i32
    %c0_i32_2 = arith.constant 0 : i32
    return %arg0, %c0_i32, %c0_i32_0, %c0_i32_1 : i32, i32, i32, i32
  }
}

module attributes {stable_mosaic.version = 11 : i64} {
  func.func @_conv2_bn_res_relu_kernel(%arg0: i32, %arg1: memref<2x10x10x8xbf16, #tpu.memory_space<vmem>>, %arg2: memref<9x8x8xbf16, #tpu.memory_space<vmem>>, %arg3: memref<1x8xf32, #tpu.memory_space<vmem>>, %arg4: memref<2x8x8x4xbf16, #tpu.memory_space<vmem>>, %arg5: memref<4x8xbf16, #tpu.memory_space<vmem>>, %arg6: memref<1x8xf32, #tpu.memory_space<vmem>>, %arg7: memref<8x128xf32, #tpu.memory_space<vmem>>) attributes {dimension_semantics = [#tpu.dimension_semantics<parallel>], iteration_bounds = array<i64: 1>, scalar_prefetch = 0 : i64, scratch_operands = 0 : i64, tpu.core_type = #tpu.core_type<tc>, window_params = [{transform_indices = @transform_0, window_bounds = array<i64: 2, 10, 10, 8>}, {pipeline_mode = #tpu.pipeline_mode<synchronous>, transform_indices = @transform_1, window_bounds = array<i64: 9, 8, 8>}, {pipeline_mode = #tpu.pipeline_mode<synchronous>, transform_indices = @transform_2, window_bounds = array<i64: 1, 8>}, {transform_indices = @transform_3, window_bounds = array<i64: 2, 8, 8, 4>}, {pipeline_mode = #tpu.pipeline_mode<synchronous>, transform_indices = @transform_4, window_bounds = array<i64: 4, 8>}, {pipeline_mode = #tpu.pipeline_mode<synchronous>, transform_indices = @transform_5, window_bounds = array<i64: 1, 8>}, {transform_indices = @transform_6, window_bounds = array<i64: 8, 128>}]} {
    %c0 = arith.constant 0 : index
    %c0_0 = arith.constant 0 : index
    %c0_1 = arith.constant 0 : index
    %c0_2 = arith.constant 0 : index
    %0 = vector.load %arg1[%c0, %c0_0, %c0_1, %c0_2] : memref<2x10x10x8xbf16, #tpu.memory_space<vmem>>, vector<2x10x10x8xbf16>
    %cst = arith.constant 0.000000e+00 : f32
    %1 = vector.broadcast %cst : f32 to vector<128x8xf32>
    %2 = vector.extract_strided_slice %0 {offsets = [0, 0, 0, 0], sizes = [2, 8, 8, 8], strides = [1, 1, 1, 1]} : vector<2x10x10x8xbf16> to vector<2x8x8x8xbf16>
    %3 = vector.shape_cast %2 : vector<2x8x8x8xbf16> to vector<128x8xbf16>
    %c0_3 = arith.constant 0 : index
    %c0_4 = arith.constant 0 : index
    %c0_5 = arith.constant 0 : index
    %4 = vector.load %arg2[%c0_3, %c0_4, %c0_5] : memref<9x8x8xbf16, #tpu.memory_space<vmem>>, vector<1x8x8xbf16>
    %5 = vector.shape_cast %4 : vector<1x8x8xbf16> to vector<8x8xbf16>
    %cst_6 = arith.constant dense<0.000000e+00> : vector<128x8xf32>
    %6 = tpu.matmul %3, %5, %cst_6 {dimension_numbers = #tpu.dot_dimension_numbers<[1], [0], [0], [1], [0, 0, 1, 1], [], []>} : vector<128x8xbf16>, vector<8x8xbf16>, vector<128x8xf32> -> vector<128x8xf32>
    %7 = arith.addf %1, %6 : vector<128x8xf32>
    %8 = vector.extract_strided_slice %0 {offsets = [0, 0, 1, 0], sizes = [2, 8, 8, 8], strides = [1, 1, 1, 1]} : vector<2x10x10x8xbf16> to vector<2x8x8x8xbf16>
    %9 = vector.shape_cast %8 : vector<2x8x8x8xbf16> to vector<128x8xbf16>
    %c1 = arith.constant 1 : index
    %c0_7 = arith.constant 0 : index
    %c0_8 = arith.constant 0 : index
    %10 = vector.load %arg2[%c1, %c0_7, %c0_8] : memref<9x8x8xbf16, #tpu.memory_space<vmem>>, vector<1x8x8xbf16>
    %11 = vector.shape_cast %10 : vector<1x8x8xbf16> to vector<8x8xbf16>
    %cst_9 = arith.constant dense<0.000000e+00> : vector<128x8xf32>
    %12 = tpu.matmul %9, %11, %cst_9 {dimension_numbers = #tpu.dot_dimension_numbers<[1], [0], [0], [1], [0, 0, 1, 1], [], []>} : vector<128x8xbf16>, vector<8x8xbf16>, vector<128x8xf32> -> vector<128x8xf32>
    %13 = arith.addf %7, %12 : vector<128x8xf32>
    %14 = vector.extract_strided_slice %0 {offsets = [0, 0, 2, 0], sizes = [2, 8, 8, 8], strides = [1, 1, 1, 1]} : vector<2x10x10x8xbf16> to vector<2x8x8x8xbf16>
    %15 = vector.shape_cast %14 : vector<2x8x8x8xbf16> to vector<128x8xbf16>
    %c2 = arith.constant 2 : index
    %c0_10 = arith.constant 0 : index
    %c0_11 = arith.constant 0 : index
    %16 = vector.load %arg2[%c2, %c0_10, %c0_11] : memref<9x8x8xbf16, #tpu.memory_space<vmem>>, vector<1x8x8xbf16>
    %17 = vector.shape_cast %16 : vector<1x8x8xbf16> to vector<8x8xbf16>
    %cst_12 = arith.constant dense<0.000000e+00> : vector<128x8xf32>
    %18 = tpu.matmul %15, %17, %cst_12 {dimension_numbers = #tpu.dot_dimension_numbers<[1], [0], [0], [1], [0, 0, 1, 1], [], []>} : vector<128x8xbf16>, vector<8x8xbf16>, vector<128x8xf32> -> vector<128x8xf32>
    %19 = arith.addf %13, %18 : vector<128x8xf32>
    %20 = vector.extract_strided_slice %0 {offsets = [0, 1, 0, 0], sizes = [2, 8, 8, 8], strides = [1, 1, 1, 1]} : vector<2x10x10x8xbf16> to vector<2x8x8x8xbf16>
    %21 = vector.shape_cast %20 : vector<2x8x8x8xbf16> to vector<128x8xbf16>
    %c3 = arith.constant 3 : index
    %c0_13 = arith.constant 0 : index
    %c0_14 = arith.constant 0 : index
    %22 = vector.load %arg2[%c3, %c0_13, %c0_14] : memref<9x8x8xbf16, #tpu.memory_space<vmem>>, vector<1x8x8xbf16>
    %23 = vector.shape_cast %22 : vector<1x8x8xbf16> to vector<8x8xbf16>
    %cst_15 = arith.constant dense<0.000000e+00> : vector<128x8xf32>
    %24 = tpu.matmul %21, %23, %cst_15 {dimension_numbers = #tpu.dot_dimension_numbers<[1], [0], [0], [1], [0, 0, 1, 1], [], []>} : vector<128x8xbf16>, vector<8x8xbf16>, vector<128x8xf32> -> vector<128x8xf32>
    %25 = arith.addf %19, %24 : vector<128x8xf32>
    %26 = vector.extract_strided_slice %0 {offsets = [0, 1, 1, 0], sizes = [2, 8, 8, 8], strides = [1, 1, 1, 1]} : vector<2x10x10x8xbf16> to vector<2x8x8x8xbf16>
    %27 = vector.shape_cast %26 : vector<2x8x8x8xbf16> to vector<128x8xbf16>
    %c4 = arith.constant 4 : index
    %c0_16 = arith.constant 0 : index
    %c0_17 = arith.constant 0 : index
    %28 = vector.load %arg2[%c4, %c0_16, %c0_17] : memref<9x8x8xbf16, #tpu.memory_space<vmem>>, vector<1x8x8xbf16>
    %29 = vector.shape_cast %28 : vector<1x8x8xbf16> to vector<8x8xbf16>
    %cst_18 = arith.constant dense<0.000000e+00> : vector<128x8xf32>
    %30 = tpu.matmul %27, %29, %cst_18 {dimension_numbers = #tpu.dot_dimension_numbers<[1], [0], [0], [1], [0, 0, 1, 1], [], []>} : vector<128x8xbf16>, vector<8x8xbf16>, vector<128x8xf32> -> vector<128x8xf32>
    %31 = arith.addf %25, %30 : vector<128x8xf32>
    %32 = vector.extract_strided_slice %0 {offsets = [0, 1, 2, 0], sizes = [2, 8, 8, 8], strides = [1, 1, 1, 1]} : vector<2x10x10x8xbf16> to vector<2x8x8x8xbf16>
    %33 = vector.shape_cast %32 : vector<2x8x8x8xbf16> to vector<128x8xbf16>
    %c5 = arith.constant 5 : index
    %c0_19 = arith.constant 0 : index
    %c0_20 = arith.constant 0 : index
    %34 = vector.load %arg2[%c5, %c0_19, %c0_20] : memref<9x8x8xbf16, #tpu.memory_space<vmem>>, vector<1x8x8xbf16>
    %35 = vector.shape_cast %34 : vector<1x8x8xbf16> to vector<8x8xbf16>
    %cst_21 = arith.constant dense<0.000000e+00> : vector<128x8xf32>
    %36 = tpu.matmul %33, %35, %cst_21 {dimension_numbers = #tpu.dot_dimension_numbers<[1], [0], [0], [1], [0, 0, 1, 1], [], []>} : vector<128x8xbf16>, vector<8x8xbf16>, vector<128x8xf32> -> vector<128x8xf32>
    %37 = arith.addf %31, %36 : vector<128x8xf32>
    %38 = vector.extract_strided_slice %0 {offsets = [0, 2, 0, 0], sizes = [2, 8, 8, 8], strides = [1, 1, 1, 1]} : vector<2x10x10x8xbf16> to vector<2x8x8x8xbf16>
    %39 = vector.shape_cast %38 : vector<2x8x8x8xbf16> to vector<128x8xbf16>
    %c6 = arith.constant 6 : index
    %c0_22 = arith.constant 0 : index
    %c0_23 = arith.constant 0 : index
    %40 = vector.load %arg2[%c6, %c0_22, %c0_23] : memref<9x8x8xbf16, #tpu.memory_space<vmem>>, vector<1x8x8xbf16>
    %41 = vector.shape_cast %40 : vector<1x8x8xbf16> to vector<8x8xbf16>
    %cst_24 = arith.constant dense<0.000000e+00> : vector<128x8xf32>
    %42 = tpu.matmul %39, %41, %cst_24 {dimension_numbers = #tpu.dot_dimension_numbers<[1], [0], [0], [1], [0, 0, 1, 1], [], []>} : vector<128x8xbf16>, vector<8x8xbf16>, vector<128x8xf32> -> vector<128x8xf32>
    %43 = arith.addf %37, %42 : vector<128x8xf32>
    %44 = vector.extract_strided_slice %0 {offsets = [0, 2, 1, 0], sizes = [2, 8, 8, 8], strides = [1, 1, 1, 1]} : vector<2x10x10x8xbf16> to vector<2x8x8x8xbf16>
    %45 = vector.shape_cast %44 : vector<2x8x8x8xbf16> to vector<128x8xbf16>
    %c7 = arith.constant 7 : index
    %c0_25 = arith.constant 0 : index
    %c0_26 = arith.constant 0 : index
    %46 = vector.load %arg2[%c7, %c0_25, %c0_26] : memref<9x8x8xbf16, #tpu.memory_space<vmem>>, vector<1x8x8xbf16>
    %47 = vector.shape_cast %46 : vector<1x8x8xbf16> to vector<8x8xbf16>
    %cst_27 = arith.constant dense<0.000000e+00> : vector<128x8xf32>
    %48 = tpu.matmul %45, %47, %cst_27 {dimension_numbers = #tpu.dot_dimension_numbers<[1], [0], [0], [1], [0, 0, 1, 1], [], []>} : vector<128x8xbf16>, vector<8x8xbf16>, vector<128x8xf32> -> vector<128x8xf32>
    %49 = arith.addf %43, %48 : vector<128x8xf32>
    %50 = vector.extract_strided_slice %0 {offsets = [0, 2, 2, 0], sizes = [2, 8, 8, 8], strides = [1, 1, 1, 1]} : vector<2x10x10x8xbf16> to vector<2x8x8x8xbf16>
    %51 = vector.shape_cast %50 : vector<2x8x8x8xbf16> to vector<128x8xbf16>
    %c8 = arith.constant 8 : index
    %c0_28 = arith.constant 0 : index
    %c0_29 = arith.constant 0 : index
    %52 = vector.load %arg2[%c8, %c0_28, %c0_29] : memref<9x8x8xbf16, #tpu.memory_space<vmem>>, vector<1x8x8xbf16>
    %53 = vector.shape_cast %52 : vector<1x8x8xbf16> to vector<8x8xbf16>
    %cst_30 = arith.constant dense<0.000000e+00> : vector<128x8xf32>
    %54 = tpu.matmul %51, %53, %cst_30 {dimension_numbers = #tpu.dot_dimension_numbers<[1], [0], [0], [1], [0, 0, 1, 1], [], []>} : vector<128x8xbf16>, vector<8x8xbf16>, vector<128x8xf32> -> vector<128x8xf32>
    %55 = arith.addf %49, %54 : vector<128x8xf32>
    %c0_31 = arith.constant 0 : index
    %c0_32 = arith.constant 0 : index
    %56 = vector.load %arg3[%c0_31, %c0_32] : memref<1x8xf32, #tpu.memory_space<vmem>>, vector<1x8xf32>
    %57 = vector.broadcast %56 : vector<1x8xf32> to vector<128x8xf32>
    %58 = arith.addf %55, %57 : vector<128x8xf32>
    %c0_33 = arith.constant 0 : index
    %c0_34 = arith.constant 0 : index
    %c0_35 = arith.constant 0 : index
    %c0_36 = arith.constant 0 : index
    %59 = vector.load %arg4[%c0_33, %c0_34, %c0_35, %c0_36] : memref<2x8x8x4xbf16, #tpu.memory_space<vmem>>, vector<2x8x8x4xbf16>
    %60 = vector.shape_cast %59 : vector<2x8x8x4xbf16> to vector<128x4xbf16>
    %c0_37 = arith.constant 0 : index
    %c0_38 = arith.constant 0 : index
    %61 = vector.load %arg5[%c0_37, %c0_38] : memref<4x8xbf16, #tpu.memory_space<vmem>>, vector<4x8xbf16>
    %cst_39 = arith.constant dense<0.000000e+00> : vector<128x8xf32>
    %62 = tpu.matmul %60, %61, %cst_39 {dimension_numbers = #tpu.dot_dimension_numbers<[1], [0], [0], [1], [0, 0, 1, 1], [], []>} : vector<128x4xbf16>, vector<4x8xbf16>, vector<128x8xf32> -> vector<128x8xf32>
    %63 = arith.addf %58, %62 : vector<128x8xf32>
    %c0_40 = arith.constant 0 : index
    %c0_41 = arith.constant 0 : index
    %64 = vector.load %arg6[%c0_40, %c0_41] : memref<1x8xf32, #tpu.memory_space<vmem>>, vector<1x8xf32>
    %65 = vector.broadcast %64 : vector<1x8xf32> to vector<128x8xf32>
    %66 = arith.addf %63, %65 : vector<128x8xf32>
    %cst_42 = arith.constant 0.000000e+00 : f32
    %67 = vector.broadcast %cst_42 : f32 to vector<128x8xf32>
    %68 = arith.maximumf %66, %67 : vector<128x8xf32>
    %69 = tpu.transpose %68, [1, 0] : vector<128x8xf32> -> vector<8x128xf32>
    %c0_43 = arith.constant 0 : index
    %c0_44 = arith.constant 0 : index
    %70 = vector.load %arg7[%c0_43, %c0_44] : memref<8x128xf32, #tpu.memory_space<vmem>>, vector<8x128xf32>
    tpu.vector_store %arg7[%c0_43, %c0_44], %69 {strides = array<i32>} : memref<8x128xf32, #tpu.memory_space<vmem>>, vector<8x128xf32>,
    return
  }
  func.func @transform_0(%arg0: i32) -> (i32, i32, i32, i32) {
    %c0_i32 = arith.constant 0 : i32
    %c0_i32_0 = arith.constant 0 : i32
    %c0_i32_1 = arith.constant 0 : i32
    %c0_i32_2 = arith.constant 0 : i32
    return %arg0, %c0_i32, %c0_i32_0, %c0_i32_1 : i32, i32, i32, i32
  }
  func.func @transform_1(%arg0: i32) -> (i32, i32, i32) {
    %c0_i32 = arith.constant 0 : i32
    %c0_i32_0 = arith.constant 0 : i32
    %c0_i32_1 = arith.constant 0 : i32
    %c0_i32_2 = arith.constant 0 : i32
    return %c0_i32, %c0_i32_0, %c0_i32_1 : i32, i32, i32
  }
  func.func @transform_2(%arg0: i32) -> (i32, i32) {
    %c0_i32 = arith.constant 0 : i32
    %c0_i32_0 = arith.constant 0 : i32
    %c0_i32_1 = arith.constant 0 : i32
    return %c0_i32, %c0_i32_0 : i32, i32
  }
  func.func @transform_3(%arg0: i32) -> (i32, i32, i32, i32) {
    %c0_i32 = arith.constant 0 : i32
    %c0_i32_0 = arith.constant 0 : i32
    %c0_i32_1 = arith.constant 0 : i32
    %c0_i32_2 = arith.constant 0 : i32
    return %arg0, %c0_i32, %c0_i32_0, %c0_i32_1 : i32, i32, i32, i32
  }
  func.func @transform_4(%arg0: i32) -> (i32, i32) {
    %c0_i32 = arith.constant 0 : i32
    %c0_i32_0 = arith.constant 0 : i32
    %c0_i32_1 = arith.constant 0 : i32
    return %c0_i32, %c0_i32_0 : i32, i32
  }
  func.func @transform_5(%arg0: i32) -> (i32, i32) {
    %c0_i32 = arith.constant 0 : i32
    %c0_i32_0 = arith.constant 0 : i32
    %c0_i32_1 = arith.constant 0 : i32
    return %c0_i32, %c0_i32_0 : i32, i32
  }
  func.func @transform_6(%arg0: i32) -> (i32, i32) {
    %c0_i32 = arith.constant 0 : i32
    %c0_i32_0 = arith.constant 0 : i32
    return %c0_i32, %arg0 : i32, i32
  }
}

</mosaic_0001>

<bundles_post_ra>
// kernel: qbasicblock_forward.2
= control target key start
LH: loop header
LB: loop body
LE: loop exit
PB: predicated region body
PF: predicated region fallthrough
CT: control target
= control target key end

     0   :  { %vm53_vm0 = vsmask.f32 3328  ;;  %vm54_vm1 = vsmask.f32 7440  ;;  %vm313_vm2 = vcmask 130048   ;;  %vm1192_vm4 = vcmask 60416   ;;  %s2832_s1 = inlined_call_operand.vmem [shape: bf16[4,16,8], index: 1, kind: input, shape index: {}]   ;;  %s2833_s0 = inlined_call_operand.vmem [shape: bf16[2,9,9,16], index: 0, kind: input, shape index: {}]   ;;  %s2834_s3 = inlined_call_operand.vmem [shape: bf16[2,10,10,8], index: 3, kind: output, shape index: {}]   ;;  %s2835_s2 = inlined_call_operand.vmem [shape: f32[1,8], index: 2, kind: input, shape index: {}]  }
   0x1   :  { %v1762_v0 = vld [vmem:[%s2832_s1 + $0x10] sm:$0xff]   ;;  %v1809_v1 = vld [vmem:[%s2833_s0 + $0x8] sm:$0xf]  ;;  %v1819_v3 = vld [vmem:[%s2833_s0 + $0x18] sm:$0xf]  ;;  %vm1198_vm7 = vcmask 57344  }
   0x2   :  { %v1814_v2 = vld [vmem:[%s2833_s0 + $0x10] sm:$0xf]  ;;  %1677 = vmatprep.subr.bf16.mxu0 %v1762_v0  ;;  %v71_v4 = vshrl.u32 %v1809_v1, 16  ;;  %v1827_v7 = vld [vmem:[%s2833_s0 + $0x20] sm:$0xf]  ;;  %v74_v8 = vshll.u32 %v1809_v1, 16  ;;  %vm1871_vm3 = vmor %vm53_vm0, %vm54_vm1 }
   0x3   :  { %v85_v5 = vshrl.u32 %v1814_v2, 16  ;;  %v88_v6 = vshll.u32 %v1814_v2, 16  ;;  %1678 = vmatpush3.bf16.msra.mxu0 %v1762_v0  ;;  %v1468_v9 = vcombine.low %v1809_v1, %v1814_v2  ;;  %v113_v10 = vshrl.u32 %v1827_v7, 16  ;;  %v1766_v14 = vld [vmem:[%s2832_s1 + $0x8] sm:$0xff]   ;;  %v1841_v15 = vld [vmem:[%s2833_s0] sm:$0xf] }
   0x4   :  { %v1469_v13 = vcombine.low %v1819_v3, %v1827_v7  ;;  %v73_v16 = vrot.slane %v71_v4, 4  ;;  %v16_v17 = vld [vmem:[%s2833_s0 + $0x4] sm:$0x1]  ;;  %v18_v18 = vld [vmem:[%s2833_s0 + $0xc] sm:$0x1]  ;;  %v116_v20 = vshll.u32 %v1827_v7, 16  ;;  %1641 = vmatprep.subr.bf16.mxu1 %v1766_v14 }
   0x5   :  { %v87_v11 = vrot.slane %v85_v5, 4  ;;  %v90_v12 = vrot.slane %v88_v6, 5  ;;  %1679 = vmatprep.mubr.msk.bf16.mxu0 %vm313_vm2, %v1468_v9  ;;  %v20_v19 = vld [vmem:[%s2833_s0 + $0x14] sm:$0x1]  ;;  %v22_v21 = vld [vmem:[%s2833_s0 + $0x1c] sm:$0x1]  ;;  %1642 = vmatpush3.bf16.msra.mxu1 %v1766_v14 }
   0x6   :  { %1680 = vmatmul.mubr.msk.bf16.vlgmr.msra.gmra.mrb[0].mxu0 %vm313_vm2, %v1469_v13  ;;  %v57_v22 = vshrl.u32 %v1841_v15, 16  ;;  %v60_v23 = vshll.u32 %v1841_v15, 16  ;;  %v24_v25 = vld [vmem:[%s2833_s0 + $0x24] sm:$0x1]  ;;  %v66_v26 = vshll.u32 %v16_v17, 16  ;;  %v76_v27 = vrot.slane %v74_v8, 5 }
   0x7   :  { %v91_v24 = vor.u32 %v90_v12, %v87_v11  ;;  %v80_v28 = vshll.u32 %v18_v18, 16  ;;  %v94_v29 = vshll.u32 %v20_v19, 16  ;;  %v99_v32 = vshrl.u32 %v1819_v3, 16  ;;  %v1867_v37 = vld [vmem:[%s2832_s1] sm:$0xff]   ;;  %v1768_v43 = vld [vmem:[%s2832_s1 + $0x18] sm:$0xff]  }
   0x8   :  { %v59_v30 = vrot.slane %v57_v22, 4  ;;  %v62_v31 = vrot.slane %v60_v23, 5  ;;  %v68_v33 = vrot.slane %v66_v26, 5  ;;  %v77_v34 = vor.u32 %v76_v27, %v73_v16  ;;  %1659 = vmatprep.subr.bf16.mxu1 %v1867_v37  ;;  %v1883_v48 = vld [vmem:[%s2833_s0 + $0x28] sm:$0xf]  ;;  %1695 = vmatprep.subr.bf16.mxu0 %v1768_v43 }
   0x9   :  { %v82_v35 = vrot.slane %v80_v28, 5  ;;  %v92_v36 = vrot.slane %v91_v24, 4  ;;  %v101_v40 = vrot.slane %v99_v32, 4  ;;  %v102_v41 = vshll.u32 %v1819_v3, 16  ;;  %1696 = vmatpush3.bf16.msra.mxu0 %v1768_v43  ;;  %v1892_v55 = vld [vmem:[%s2833_s0 + $0x30] sm:$0xf] }
   0xa   :  { %v63_v39 = vor.u32 %v62_v31, %v59_v30  ;;  %v108_v42 = vshll.u32 %v22_v21, 16  ;;  %v78_v44 = vrot.slane %v77_v34, 4  ;;  %v96_v45 = vrot.slane %v94_v29, 5  ;;  %v1901_v60 = vld [vmem:[%s2833_s0 + $0x38] sm:$0xf] }
   0xb   :  { %v115_v46 = vrot.slane %v113_v10, 4  ;;  %v118_v47 = vrot.slane %v116_v20, 5  ;;  %v104_v50 = vrot.slane %v102_v41, 5  ;;  %v122_v51 = vshll.u32 %v24_v25, 16  ;;  %v1906_v61 = vld [vmem:[%s2833_s0 + $0x40] sm:$0xf] }
   0xc   :  { %v64_v49 = vrot.slane %v63_v39, 4  ;;  %v1887_v52 = vsel %vm1871_vm3, %v78_v44, %v82_v35  ;;  %v110_v53 = vrot.slane %v108_v42, 5  ;;  %v127_v58 = vshrl.u32 %v1883_v48, 16  ;;  %v26_v5 = vld [vmem:[%s2833_s0 + $0x2c] sm:$0x1] }
   0xd   :  { %v119_v54 = vor.u32 %v118_v47, %v115_v46  ;;  %v105_v57 = vor.u32 %v104_v50, %v101_v40  ;;  %v130_v59 = vshll.u32 %v1883_v48, 16  ;;  %v1910_v62 = vsel %vm1871_vm3, %v92_v36, %v96_v45  ;;  %v28_v14 = vld [vmem:[%s2833_s0 + $0x34] sm:$0x1]  ;;  %v30_v20 = vld [vmem:[%s2833_s0 + $0x3c] sm:$0x1] }
   0xe   :  { %v69_v56 = vsel %vm1871_vm3, %v64_v49, %v68_v33  ;;  %v124_v0 = vrot.slane %v122_v51, 5  ;;  %v141_v8 = vshrl.u32 %v1892_v55, 16  ;;  %v144_v9 = vshll.u32 %v1892_v55, 16  ;;  %v1949_v29 = vld [vmem:[%s2833_s0 + $0x50] sm:$0xf] }
   0xf   :  { %v120_v63 = vrot.slane %v119_v54, 4  ;;  %v1432_v4 = vcombine.low %v69_v56, %v1887_v52  ;;  %v106_v6 = vrot.slane %v105_v57, 4  ;;  %v1470_v10 = vcombine.low %v1883_v48, %v1892_v55  ;;  %v1955_v34 = vld [vmem:[%s2833_s0 + $0x58] sm:$0xf]  ;;  %v1964_v41 = vld [vmem:[%s2833_s0 + $0x60] sm:$0xf] }
  0x10   :  { %v155_v11 = vshrl.u32 %v1901_v60, 16  ;;  %v158_v12 = vshll.u32 %v1901_v60, 16  ;;  %v1471_v13 = vcombine.low %v1901_v60, %v1906_v61  ;;  %v129_v17 = vrot.slane %v127_v58, 4  ;;  %v1970_v46 = vld [vmem:[%s2833_s0 + $0x68] sm:$0xf] }
  0x11   :  { %1643 = vmatprep.mubr.msk.bf16.mxu1 %vm313_vm2, %v1432_v4  ;;  %v1930_v16 = vsel %vm1871_vm3, %v106_v6, %v110_v53  ;;  %1683 = vmatprep.mubr.msk.bf16.mxu0 %vm313_vm2, %v1470_v10  ;;  %v132_v18 = vrot.slane %v130_v59, 5  ;;  %v136_v19 = vshll.u32 %v26_v5, 16  ;;  %v1938_v21 = vsel %vm1871_vm3, %v120_v63, %v124_v0  ;;  %v1982_v51 = vld [vmem:[%s2833_s0 + $0x48] sm:$0xf]  ;;  %v34_v53 = vld [vmem:[%s2833_s0 + $0x4c] sm:$0x1] }
  0x12   :  { %v1433_v22 = vcombine.low %v1910_v62, %v1930_v16  ;;  %v1487_v23 = vcombine.low %v1887_v52, %v1910_v62  ;;  %1684 = vmatmul.mubr.msk.bf16.gmra.mrb[4].mxu0 %vm313_vm2, %v1471_v13  ;;  %v761_v24 = vshrl.u32 %v1906_v61, 16  ;;  %v143_v27 = vrot.slane %v141_v8, 4  ;;  %v36_v59 = vld [vmem:[%s2833_s0 + $0x54] sm:$0x1]  ;;  %v32_v52 = vld [vmem:[%s2833_s0 + $0x44] sm:$0x1] }
  0x13   :  { %v133_v25 = vor.u32 %v132_v18, %v129_v17  ;;  %v138_v26 = vrot.slane %v136_v19, 5  ;;  %v146_v28 = vrot.slane %v144_v9, 5  ;;  %v150_v30 = vshll.u32 %v28_v14, 16  ;;  %v40_v18 = vld [vmem:[%s2833_s0 + $0x64] sm:$0x1] }
  0x14   :  { %1644 = vmatmul.mubr.msk.bf16.vlgmr.msra.gmra.mrb[0].mxu1 %vm313_vm2, %v1433_v22  ;;  %v157_v31 = vrot.slane %v155_v11, 4  ;;  %v160_v32 = vrot.slane %v158_v12, 5  ;;  %v164_v33 = vshll.u32 %v30_v20, 16  ;;  %v1488_v35 = vcombine.low %v1930_v16, %v1938_v21  ;;  %v38_v11 = vld [vmem:[%s2833_s0 + $0x5c] sm:$0x1] }
  0x15   :  { %1660 = vmatpush3.bf16.msra.mxu1 %v1867_v37  ;;  %v764_v36 = vshll.u32 %v1906_v61, 16  ;;  %v134_v39 = vrot.slane %v133_v25, 4  ;;  %v147_v40 = vor.u32 %v146_v28, %v143_v27  ;;  %v152_v42 = vrot.slane %v150_v30, 5 }
  0x16   :  { %v161_v43 = vor.u32 %v160_v32, %v157_v31  ;;  %v166_v44 = vrot.slane %v164_v33, 5  ;;  %v183_v45 = vshrl.u32 %v1949_v29, 16  ;;  %v186_v49 = vshll.u32 %v1949_v29, 16 }
  0x17   :  { %v1974_v37 = vsel %vm1871_vm3, %v134_v39, %v138_v26  ;;  %v148_v47 = vrot.slane %v147_v40, 4  ;;  %v1472_v50 = vcombine.low %v1949_v29, %v1955_v34  ;;  %v197_v57 = vshrl.u32 %v1955_v34, 16  ;;  %v2023_v40 = vld [vmem:[%s2833_s0 + $0x70] sm:$0xf] }
  0x18   :  { %v1434_v54 = vcombine.low %v1938_v21, %v1974_v37  ;;  %v162_v56 = vrot.slane %v161_v43, 4  ;;  %v200_v58 = vshll.u32 %v1955_v34, 16  ;;  %v211_v0 = vshrl.u32 %v1964_v41, 16 }
  0x19   :  { %v1996_v63 = vsel %vm1871_vm3, %v148_v47, %v152_v42  ;;  %1687 = vmatprep.mubr.msk.bf16.mxu0 %vm313_vm2, %v1472_v50  ;;  %v214_v4 = vshll.u32 %v1964_v41, 16  ;;  %v1473_v5 = vcombine.low %v1964_v41, %v1970_v46  ;;  %v169_v8 = vshrl.u32 %v1982_v51, 16  ;;  %v2029_v47 = vld [vmem:[%s2833_s0 + $0x78] sm:$0xf] }
  0x1a   :  { %1647 = vmatprep.mubr.msk.bf16.mxu1 %vm313_vm2, %v1434_v54  ;;  %v2006_v6 = vsel %vm1871_vm3, %v162_v56, %v166_v44  ;;  %v172_v9 = vshll.u32 %v1982_v51, 16  ;;  %v178_v10 = vshll.u32 %v34_v53, 16  ;;  %v185_v13 = vrot.slane %v183_v45, 4  ;;  %v2035_v56 = vld [vmem:[%s2833_s0 + $0x88] sm:$0xf] }
  0x1b   :  { %v1435_v12 = vcombine.low %v1996_v63, %v2006_v6  ;;  %1688 = vmatmul.mubr.msk.bf16.gmra.mrb[8].mxu0 %vm313_vm2, %v1473_v5  ;;  %v188_v14 = vrot.slane %v186_v49, 5  ;;  %v192_v17 = vshll.u32 %v36_v59, 16  ;;  %v171_v19 = vrot.slane %v169_v8, 4 }
  0x1c   :  { %v174_v20 = vrot.slane %v172_v9, 5  ;;  %v180_v22 = vrot.slane %v178_v10, 5  ;;  %v199_v25 = vrot.slane %v197_v57, 4  ;;  %v202_v28 = vrot.slane %v200_v58, 5 }
  0x1d   :  { %1648 = vmatmul.mubr.msk.bf16.gmra.mrb[4].mxu1 %vm313_vm2, %v1435_v12  ;;  %v189_v26 = vor.u32 %v188_v14, %v185_v13  ;;  %v194_v27 = vrot.slane %v192_v17, 5  ;;  %v206_v30 = vshll.u32 %v38_v11, 16  ;;  %v213_v32 = vrot.slane %v211_v0, 4  ;;  %v42_v11 = vld [vmem:[%s2833_s0 + $0x6c] sm:$0x1] }
  0x1e   :  { %v175_v31 = vor.u32 %v174_v20, %v171_v19  ;;  %v216_v33 = vrot.slane %v214_v4, 5  ;;  %v220_v39 = vshll.u32 %v40_v18, 16  ;;  %v225_v42 = vshrl.u32 %v1970_v46, 16  ;;  %v2046_v4 = vld [vmem:[%s2833_s0 + $0x80] sm:$0xf] }
  0x1f   :  { %v190_v43 = vrot.slane %v189_v26, 4  ;;  %v203_v44 = vor.u32 %v202_v28, %v199_v25  ;;  %v208_v45 = vrot.slane %v206_v30, 5  ;;  %v228_v49 = vshll.u32 %v1970_v46, 16  ;;  %v44_v18 = vld [vmem:[%s2833_s0 + $0x74] sm:$0x1] }
  0x20   :  { %v176_v50 = vrot.slane %v175_v31, 4  ;;  %v217_v53 = vor.u32 %v216_v33, %v213_v32  ;;  %v222_v54 = vrot.slane %v220_v39, 5  ;;  %v239_v59 = vshrl.u32 %v2023_v40, 16  ;;  %v46_v31 = vld [vmem:[%s2833_s0 + $0x7c] sm:$0x1] }
  0x21   :  { %v2039_v57 = vsel %vm1871_vm3, %v190_v43, %v194_v27  ;;  %v204_v58 = vrot.slane %v203_v44, 4  ;;  %v242_v0 = vshll.u32 %v2023_v40, 16  ;;  %v253_v9 = vshrl.u32 %v2029_v47, 16  ;;  %v48_v43 = vld [vmem:[%s2833_s0 + $0x84] sm:$0x1] }
  0x22   :  { %v181_v5 = vsel %vm1871_vm3, %v176_v50, %v180_v22  ;;  %v218_v8 = vrot.slane %v217_v53, 4  ;;  %v1474_v10 = vcombine.low %v2023_v40, %v2029_v47  ;;  %v256_v14 = vshll.u32 %v2029_v47, 16 }
  0x23   :  { %v1436_v12 = vcombine.low %v181_v5, %v2039_v57  ;;  %v2059_v13 = vsel %vm1871_vm3, %v204_v58, %v208_v45  ;;  %v1475_v17 = vcombine.low %v2046_v4, %v2035_v56  ;;  %v267_v20 = vshrl.u32 %v2046_v4, 16 }
  0x24   :  { %v2069_v19 = vsel %vm1871_vm3, %v218_v8, %v222_v54  ;;  %1691 = vmatprep.mubr.msk.bf16.mxu0 %vm313_vm2, %v1474_v10  ;;  %v270_v22 = vshll.u32 %v2046_v4, 16  ;;  %v227_v25 = vrot.slane %v225_v42, 4  ;;  %v230_v27 = vrot.slane %v228_v49, 5 }
  0x25   :  { %1651 = vmatprep.mubr.msk.bf16.mxu1 %vm313_vm2, %v1436_v12  ;;  %v1437_v26 = vcombine.low %v2059_v13, %v2069_v19  ;;  %1692 = vmatmul.mubr.msk.bf16.gmra.mrb[12].mxu0 %vm313_vm2, %v1475_v17  ;;  %v234_v28 = vshll.u32 %v42_v11, 16  ;;  %v241_v30 = vrot.slane %v239_v59, 4  ;;  %v763_v32 = vrot.slane %v761_v24, 4 }
  0x26   :  { %v766_v33 = vrot.slane %v764_v36, 5  ;;  %v244_v39 = vrot.slane %v242_v0, 5  ;;  %v248_v42 = vshll.u32 %v44_v18, 16  ;;  %1697 = vmatprep.mubr.msk.bf16.mxu0 %vm313_vm2, %v1487_v23  ;;  %v231_v44 = vor.u32 %v230_v27, %v227_v25 }
  0x27   :  { %1652 = vmatmul.mubr.msk.bf16.gmra.mrb[8].mxu1 %vm313_vm2, %v1437_v26  ;;  %v236_v45 = vrot.slane %v234_v28, 5  ;;  %v255_v49 = vrot.slane %v253_v9, 4  ;;  %v258_v24 = vrot.slane %v256_v14, 5  ;;  %v262_v36 = vshll.u32 %v46_v31, 16 }
  0x28   :  { %v245_v50 = vor.u32 %v244_v39, %v241_v30  ;;  %v250_v61 = vrot.slane %v248_v42, 5  ;;  %v269_v53 = vrot.slane %v267_v20, 4  ;;  %v232_v54 = vrot.slane %v231_v44, 4 }
  0x29   :  { %v259_v58 = vor.u32 %v258_v24, %v255_v49  ;;  %v272_v59 = vrot.slane %v270_v22, 5  ;;  %v276_v0 = vshll.u32 %v48_v43, 16  ;;  %v264_v23 = vrot.slane %v262_v36, 5 }
  0x2a   :  { %v246_v62 = vrot.slane %v245_v50, 4  ;;  %v1489_v5 = vcombine.low %v1974_v37, %v1996_v63  ;;  %v767_v8 = vor.u32 %v766_v33, %v763_v32  ;;  %v237_v9 = vsel %vm1871_vm3, %v232_v54, %v236_v45  ;;  %v50_v32 = vld [vmem:[%s2833_s0 + $0x8c] sm:$0x1] }
  0x2b   :  { %v260_v10 = vrot.slane %v259_v58, 4  ;;  %v273_v11 = vor.u32 %v272_v59, %v269_v53  ;;  %v278_v12 = vrot.slane %v276_v0, 5  ;;  %v770_v18 = vshll.u32 %v32_v52, 16 }
  0x2c   :  { %v251_v14 = vsel %vm1871_vm3, %v246_v62, %v250_v61  ;;  %v768_v17 = vrot.slane %v767_v8, 4  ;;  %v775_v37 = vshrl.u32 %v2035_v56, 16  ;;  %v778_v63 = vshll.u32 %v2035_v56, 16 }
  0x2d   :  { %v1438_v20 = vcombine.low %v237_v9, %v251_v14  ;;  %v265_v22 = vsel %vm1871_vm3, %v260_v10, %v264_v23  ;;  %v274_v25 = vrot.slane %v273_v11, 4  ;;  %1698 = vmatmul.mubr.msk.bf16.vlgmr.msra.gmra.mrb[0].mxu0 %vm313_vm2, %v1488_v35  ;;  %v772_v26 = vrot.slane %v770_v18, 5  ;;  %v2270_v11 = vld [vmem:[%s2835_s2] ss:$0 sm:$0xff] }
  0x2e   :  { %1701 = vmatprep.mubr.msk.bf16.mxu0 %vm313_vm2, %v1489_v5  ;;  %v1449_v28 = vcombine.low %v1841_v15, %v1809_v1  ;;  %v777_v35 = vrot.slane %v775_v37, 4  ;;  %v780_v31 = vrot.slane %v778_v63, 5  ;;  %v1491_v56 = vcombine.low %v2039_v57, %v2059_v13 }
  0x2f   :  { %1655 = vmatprep.mubr.msk.bf16.mxu1 %vm313_vm2, %v1438_v20  ;;  %v279_v27 = vsel %vm1871_vm3, %v274_v25, %v278_v12  ;;  %v773_v16 = vsel %vm1871_vm3, %v768_v17, %v772_v26  ;;  %v1450_v1 = vcombine.low %v1814_v2, %v1819_v3  ;;  %v1451_v33 = vcombine.low %v1827_v7, %v1883_v48 }
  0x30   :  { %v1439_v30 = vcombine.low %v265_v22, %v279_v27  ;;  %v1490_v21 = vcombine.low %v2006_v6, %v773_v16  ;;  %v781_v15 = vor.u32 %v780_v31, %v777_v35  ;;  %v784_v6 = vshll.u32 %v50_v32, 16 }
  0x31   :  { %v1492_v57 = vcombine.low %v2069_v19, %v237_v9  ;;  %v1493_v13 = vcombine.low %v251_v14, %v265_v22  ;;  %v1452_v2 = vcombine.low %v1892_v55, %v1901_v60  ;;  %v1453_v7 = vcombine.low %v1982_v51, %v1949_v29 }
  0x32   :  { %1656 = vmatmul.mubr.msk.bf16.gmra.mrb[12].mxu1 %vm313_vm2, %v1439_v30  ;;  %v782_v39 = vrot.slane %v781_v15, 4  ;;  %v786_v42 = vrot.slane %v784_v6, 5  ;;  %v1454_v19 = vcombine.low %v1955_v34, %v1964_v41  ;;  %v1455_v55 = vcombine.low %v1970_v46, %v2023_v40 }
  0x33   :  { %1661 = vmatprep.mubr.msk.bf16.mxu1 %vm313_vm2, %v1449_v28  ;;  %v1456_v38 = vcombine.low %v2029_v47, %v2046_v4  ;;  %vm1193_vm5 = vsmask.f32 7938  ;;  %v1782_v29 = vmov 0   ;;  %vm1199_vm8 = vsmask.f32 256 }
  0x34   :  { %v787_v3 = vsel %vm1871_vm3, %v782_v39, %v786_v42  ;;  %vm2156_vm6 = vmand %vm1192_vm4, %vm1193_vm5  ;;  %1295 = vst.msk [vmem:[%s2834_s3] sm:$0xf] %vm1192_vm4, %v1782_v29 }
  0x35   :  { %1702 = vmatmul.mubr.msk.bf16.gmra.mrb[4].mxu0 %vm313_vm2, %v1490_v21  ;;  %v1494_v48 = vcombine.low %v279_v27, %v787_v3  ;;  %1297 = vst.msk [vmem:[%s2834_s3 + $0x4] sm:$0x1] %vm1198_vm7, %v1782_v29  ;;  %1299 = vst.msk [vmem:[%s2834_s3 + $0x54] sm:$0x1] %vm1198_vm7, %v1782_v29  ;;  %v1531_v3 = vld [vmem:[%s2834_s3 + $0x1c] sm:$0x1] }
  0x36   :  { %1705 = vmatprep.mubr.msk.bf16.mxu0 %vm313_vm2, %v1491_v56  ;;  %1298 = vst.msk [vmem:[%s2834_s3 + $0x50] sm:$0xf] %vm1192_vm4, %v1782_v29  ;;  %1585 = vst.msk [vmem:[%s2834_s3 + $0x48] sm:$0xf] %vm1192_vm4, %v1782_v29 }
  0x37   :  { %1586 = vst.msk [vmem:[%s2834_s3 + $0x4c] sm:$0x1] %vm1198_vm7, %v1782_v29  ;;  %1588 = vst.msk [vmem:[%s2834_s3 + $0x9c] sm:$0x1] %vm1198_vm7, %v1782_v29 }
  0x38   :  { %1587 = vst.msk [vmem:[%s2834_s3 + $0x98] sm:$0xf] %vm1192_vm4, %v1782_v29  ;;  %vm2189_vm9 = vmand %vm1198_vm7, %vm1199_vm8 }
  0x39   :  { %vm2216_vm10 = vmand %vm1198_vm7, %vm1193_vm5 }
  0x3a   :  { %1662 = vmatmul.mubr.msk.bf16.vlgmr.msra.gmra.mrb[0].mxu1 %vm313_vm2, %v1450_v1 }
  0x3b   :  { %1665 = vmatprep.mubr.msk.bf16.mxu1 %vm313_vm2, %v1451_v33  ;;  %v1305_v41 = vld [vmem:[%s2834_s3] sm:$0x1] }
  0x3c   :  { %v1306_v46 = vsel %vm2189_vm9, 0, %v1305_v41  ;;  %v1366_v45 = vld [vmem:[%s2834_s3 + $0x4] sm:$0x1]  ;;  %v1396_v61 = vld [vmem:[%s2834_s3 + $0x54] sm:$0x1] }
  0x3d   :  { %1706 = vmatmul.mubr.msk.bf16.gmra.mrb[8].mxu0 %vm313_vm2, %v1492_v57  ;;  %v1332_v51 = vld [vmem:[%s2834_s3 + $0x48] sm:$0x1]  ;;  %v1335_v40 = vld [vmem:[%s2834_s3 + $0x50] sm:$0x1]  ;;  %1307 = vst [vmem:[%s2834_s3] sm:$0x1] %v1306_v46  ;;  %v1367_v24 = vsel %vm2216_vm10, 0, %v1366_v45 }
  0x3e   :  { %1709 = vmatprep.mubr.msk.bf16.mxu0 %vm313_vm2, %v1493_v13  ;;  %v1333_v47 = vsel %vm2189_vm9, 0, %v1332_v51  ;;  %v1336_v4 = vsel %vm2189_vm9, 0, %v1335_v40  ;;  %v1393_v50 = vld [vmem:[%s2834_s3 + $0x4c] sm:$0x1]  ;;  %1368 = vst [vmem:[%s2834_s3 + $0x4] sm:$0x1] %v1367_v24 }
  0x3f   :  { %v1362_v43 = vld [vmem:[%s2834_s3 + $0x98] sm:$0x1]  ;;  %1334 = vst [vmem:[%s2834_s3 + $0x48] sm:$0x1] %v1333_v47  ;;  %1337 = vst [vmem:[%s2834_s3 + $0x50] sm:$0x1] %v1336_v4 }
  0x40   :  { %v1363_v49 = vsel %vm2189_vm9, 0, %v1362_v43  ;;  %v1394_v36 = vsel %vm2216_vm10, 0, %v1393_v50  ;;  %v1397_v53 = vsel %vm2216_vm10, 0, %v1396_v61  ;;  %v1423_v54 = vld [vmem:[%s2834_s3 + $0x9c] sm:$0x1] }
  0x41   :  { %1364 = vst [vmem:[%s2834_s3 + $0x98] sm:$0x1] %v1363_v49  ;;  %1395 = vst [vmem:[%s2834_s3 + $0x4c] sm:$0x1] %v1394_v36  ;;  %v1424_v58 = vsel %vm2216_vm10, 0, %v1423_v54 }
  0x42   :  { %1666 = vmatmul.mubr.msk.bf16.gmra.mrb[4].mxu1 %vm313_vm2, %v1452_v2  ;;  %1398 = vst [vmem:[%s2834_s3 + $0x54] sm:$0x1] %v1397_v53  ;;  %1425 = vst [vmem:[%s2834_s3 + $0x9c] sm:$0x1] %v1424_v58  ;;  %v1529_v2 = vld [vmem:[%s2834_s3 + $0x18] sm:$0xf] }
  0x43   :  { %1669 = vmatprep.mubr.msk.bf16.mxu1 %vm313_vm2, %v1453_v7  ;;  %v1521_v41 = vld [vmem:[%s2834_s3 + $0x8] sm:$0xf]  ;;  %v1523_v45 = vld [vmem:[%s2834_s3 + $0xc] sm:$0x1]  ;;  %v1533_v58 = vld [vmem:[%s2834_s3 + $0x20] sm:$0xf] }
  0x45   :  { %1710 = vmatmul.mubr.msk.bf16.gmra.mrb[12].mxu0 %vm313_vm2, %v1494_v48 }
  0x4a   :  { %1670 = vmatmul.mubr.msk.bf16.gmra.mrb[8].mxu1 %vm313_vm2, %v1454_v19 }
  0x4b   :  { %1673 = vmatprep.mubr.msk.bf16.mxu1 %vm313_vm2, %v1455_v55 }
  0x52   :  { %1674 = vmatmul.mubr.msk.bf16.gmra.mrb[12].mxu1 %vm313_vm2, %v1456_v38 }
 0x100   :  { %v1699_v59 = vpop.f32.mrb[0].mxu0 }
 0x101   :  { %v865_v0 = vpop.f32.mrb[1].mxu0 }
 0x102   :  { %v1700_v52 = vpop.f32.mrb[2].mxu0 }
 0x103   :  { %v868_v62 = vpop.f32.mrb[3].mxu0 }
 0x108   :  { %v1703_v23 = vpop.f32.mrb[4].mxu0 }
 0x109   :  { %v881_v5 = vpop.f32.mrb[5].mxu0 }
 0x10a   :  { %v2263_v8 = vpop.f32.mrb[6].mxu0 }
 0x10b   :  { %v2265_v9 = vpop.f32.mrb[7].mxu0 }
 0x10d   :  { %v1663_v10 = vpop.f32.mrb[0].mxu1 }
 0x10e   :  { %v1713_v12 = vadd.f32 %v1699_v59, %v1663_v10  ;;  %v539_v14 = vpop.f32.mrb[1].mxu1 }
 0x10f   :  { %v1714_v17 = vadd.f32 %v865_v0, %v539_v14  ;;  %v1664_v18 = vpop.f32.mrb[2].mxu1 }
 0x110   :  { %v953_v20 = vadd.f32 %v1713_v12, %v2270_v11  ;;  %v1715_v22 = vadd.f32 %v1700_v52, %v1664_v18  ;;  %v542_v25 = vpop.f32.mrb[3].mxu1  ;;  %v2273_v37 = vpop.f32.mrb[8].mxu0 }
 0x111   :  { %v951_v63 = vadd.f32 %v1714_v17, %v2270_v11  ;;  %v1716_v26 = vadd.f32 %v868_v62, %v542_v25  ;;  %v2276_v27 = vpop.f32.mrb[9].mxu0  ;;  %v1527_v25 = vld [vmem:[%s2834_s3 + $0x14] sm:$0x1] }
 0x112   :  { %v969_v28 = vmax.f32 %v953_v20, 0.0  ;;  %v954_v30 = vadd.f32 %v1715_v22, %v2270_v11  ;;  %v2279_v16 = vpop.f32.mrb[10].mxu0  ;;  %v1525_v22 = vld [vmem:[%s2834_s3 + $0x10] sm:$0xf] }
 0x113   :  { %v967_v21 = vmax.f32 %v951_v63, 0.0  ;;  %v952_v35 = vadd.f32 %v1716_v26, %v2270_v11  ;;  %v2282_v31 = vpop.f32.mrb[11].mxu0 }
 0x114   :  { %v1591_v56 = vpack.c.bf16 %v969_v28, %v969_v28  ;;  %v970_v32 = vmax.f32 %v954_v30, 0.0 }
 0x115   :  { %v1589_v1 = vpack.c.bf16 %v967_v21, %v967_v21  ;;  %v968_v15 = vmax.f32 %v952_v35, 0.0  ;;  %v1667_v6 = vpop.f32.mrb[4].mxu1 }
 0x116   :  { %v1048_v33 = vshrl.u32 %v1591_v56, 16  ;;  %v1051_v57 = vshll.u32 %v1591_v56, 16  ;;  %v1592_v13 = vpack.c.bf16 %v970_v32, %v970_v32  ;;  %v1717_v39 = vadd.f32 %v1703_v23, %v1667_v6  ;;  %v555_v42 = vpop.f32.mrb[5].mxu1  ;;  %v1535_v23 = vld [vmem:[%s2834_s3 + $0x24] sm:$0x1] }
 0x117   :  { %v1032_v7 = vshrl.u32 %v1589_v1, 16  ;;  %v1035_v48 = vshll.u32 %v1589_v1, 16  ;;  %v1590_v19 = vpack.c.bf16 %v968_v15, %v968_v15  ;;  %v1718_v55 = vadd.f32 %v881_v5, %v555_v42  ;;  %v1668_v38 = vpop.f32.mrb[6].mxu1 }
 0x118   :  { %v1050_v29 = vrot.slane %v1048_v33, 7  ;;  %v1056_v46 = vshrl.u32 %v1592_v13, 16  ;;  %v1059_v51 = vshll.u32 %v1592_v13, 16  ;;  %v957_v40 = vadd.f32 %v1717_v39, %v2270_v11  ;;  %v558_v47 = vpop.f32.mrb[7].mxu1  ;;  %v2294_v4 = vpop.f32.mrb[12].mxu0 }
 0x119   :  { %v1034_v43 = vrot.slane %v1032_v7, 7  ;;  %v1040_v49 = vshrl.u32 %v1590_v19, 16  ;;  %v1043_v24 = vshll.u32 %v1590_v19, 16  ;;  %v955_v50 = vadd.f32 %v1718_v55, %v2270_v11  ;;  %v2300_v61 = vpop.f32.mrb[13].mxu0 }
 0x11a   :  { %v1053_v36 = vor.u32 %v1051_v57, %v1050_v29  ;;  %v1054_v53 = vrot.slane %v1050_v29, 4  ;;  %v1058_v54 = vrot.slane %v1056_v46, 7  ;;  %v973_v59 = vmax.f32 %v957_v40, 0.0  ;;  %v2305_v0 = vpop.f32.mrb[14].mxu0  ;;  %v1545_v29 = vld [vmem:[%s2834_s3 + $0x38] sm:$0xf] }
 0x11b   :  { %v1037_v52 = vor.u32 %v1035_v48, %v1034_v43  ;;  %v1038_v62 = vrot.slane %v1034_v43, 4  ;;  %v1042_v5 = vrot.slane %v1040_v49, 7  ;;  %v971_v10 = vmax.f32 %v955_v50, 0.0  ;;  %v2310_v12 = vpop.f32.mrb[15].mxu0 }
 0x11c   :  { %v1211_v14 = vsel %vm2156_vm6, %v1053_v36, %v1529_v2  ;;  %v1214_v17 = vsel %vm2189_vm9, %v1054_v53, %v1531_v3  ;;  %v1061_v18 = vor.u32 %v1059_v51, %v1058_v54  ;;  %v1062_v20 = vrot.slane %v1058_v54, 4 }
 0x11d   :  { %1530 = vst [vmem:[%s2834_s3 + $0x18] sm:$0xf] %v1211_v14  ;;  %1532 = vst [vmem:[%s2834_s3 + $0x1c] sm:$0x1] %v1214_v17  ;;  %v1196_v63 = vsel %vm2156_vm6, %v1037_v52, %v1521_v41  ;;  %v1202_v26 = vsel %vm2189_vm9, %v1038_v62, %v1523_v45  ;;  %v1045_v28 = vor.u32 %v1043_v24, %v1042_v5  ;;  %v1046_v30 = vrot.slane %v1042_v5, 4  ;;  %v1671_v21 = vpop.f32.mrb[8].mxu1 }
 0x11e   :  { %1522 = vst [vmem:[%s2834_s3 + $0x8] sm:$0xf] %v1196_v63  ;;  %1524 = vst [vmem:[%s2834_s3 + $0xc] sm:$0x1] %v1202_v26  ;;  %v1217_v35 = vsel %vm2156_vm6, %v1061_v18, %v1533_v58  ;;  %v1220_v56 = vsel %vm2189_vm9, %v1062_v20, %v1535_v23  ;;  %v1595_v32 = vpack.c.bf16 %v973_v59, %v973_v59  ;;  %v571_v15 = vpop.f32.mrb[9].mxu1 }
 0x11f   :  { %v1593_v1 = vpack.c.bf16 %v971_v10, %v971_v10  ;;  %1534 = vst [vmem:[%s2834_s3 + $0x20] sm:$0xf] %v1217_v35  ;;  %1536 = vst [vmem:[%s2834_s3 + $0x24] sm:$0x1] %v1220_v56  ;;  %v1205_v6 = vsel %vm2156_vm6, %v1045_v28, %v1525_v22  ;;  %v1208_v33 = vsel %vm2189_vm9, %v1046_v30, %v1527_v25  ;;  %v1672_v39 = vpop.f32.mrb[10].mxu1 }
 0x120   :  { %v1719_v57 = vadd.f32 %v2263_v8, %v1668_v38  ;;  %v1720_v13 = vadd.f32 %v2265_v9, %v558_v47  ;;  %1526 = vst [vmem:[%s2834_s3 + $0x10] sm:$0xf] %v1205_v6  ;;  %1528 = vst [vmem:[%s2834_s3 + $0x14] sm:$0x1] %v1208_v33  ;;  %v1080_v42 = vshrl.u32 %v1595_v32, 16  ;;  %v1083_v2 = vshll.u32 %v1595_v32, 16 }
 0x121   :  { %v1064_v3 = vshrl.u32 %v1593_v1, 16  ;;  %v1067_v7 = vshll.u32 %v1593_v1, 16  ;;  %v574_v48 = vpop.f32.mrb[11].mxu1  ;;  %v1721_v9 = vadd.f32 %v2273_v37, %v1671_v21  ;;  %v1722_v55 = vadd.f32 %v2276_v27, %v571_v15  ;;  %v1547_v41 = vld [vmem:[%s2834_s3 + $0x3c] sm:$0x1] }
 0x122   :  { %v958_v19 = vadd.f32 %v1719_v57, %v2270_v11  ;;  %v956_v8 = vadd.f32 %v1720_v13, %v2270_v11  ;;  %v1082_v38 = vrot.slane %v1080_v42, 7  ;;  %v1723_v51 = vadd.f32 %v2279_v16, %v1672_v39  ;;  %v1537_v37 = vld [vmem:[%s2834_s3 + $0x28] sm:$0xf]  ;;  %v1539_v27 = vld [vmem:[%s2834_s3 + $0x2c] sm:$0x1] }
 0x123   :  { %v1066_v46 = vrot.slane %v1064_v3, 7  ;;  %v1724_v40 = vadd.f32 %v2282_v31, %v574_v48  ;;  %v961_v45 = vadd.f32 %v1721_v9, %v2270_v11  ;;  %v959_v49 = vadd.f32 %v1722_v55, %v2270_v11  ;;  %v1549_v42 = vld [vmem:[%s2834_s3 + $0x40] sm:$0xf]  ;;  %v1541_v9 = vld [vmem:[%s2834_s3 + $0x30] sm:$0xf] }
 0x124   :  { %v974_v47 = vmax.f32 %v958_v19, 0.0  ;;  %v972_v43 = vmax.f32 %v956_v8, 0.0  ;;  %v1314_v16 = vld [vmem:[%s2834_s3 + $0x18] sm:$0x1]  ;;  %v1375_v31 = vld [vmem:[%s2834_s3 + $0x1c] sm:$0x1]  ;;  %v1085_v24 = vor.u32 %v1083_v2, %v1082_v38  ;;  %v962_v2 = vadd.f32 %v1723_v51, %v2270_v11 }
 0x125   :  { %v1086_v50 = vrot.slane %v1082_v38, 4  ;;  %v1069_v36 = vor.u32 %v1067_v7, %v1066_v46  ;;  %v1070_v53 = vrot.slane %v1066_v46, 4  ;;  %v1315_v54 = vsel %vm2189_vm9, 0, %v1314_v16  ;;  %v1308_v59 = vld [vmem:[%s2834_s3 + $0x8] sm:$0x1]  ;;  %v1675_v1 = vpop.f32.mrb[12].mxu1 }
 0x126   :  { %v1376_v58 = vsel %vm2216_vm10, 0, %v1375_v31  ;;  %v1369_v52 = vld [vmem:[%s2834_s3 + $0xc] sm:$0x1]  ;;  %v1596_v62 = vpack.c.bf16 %v974_v47, %v974_v47  ;;  %v1594_v23 = vpack.c.bf16 %v972_v43, %v972_v43  ;;  %1316 = vst [vmem:[%s2834_s3 + $0x18] sm:$0x1] %v1315_v54  ;;  %v1309_v5 = vsel %vm2189_vm9, 0, %v1308_v59 }
 0x127   :  { %1377 = vst [vmem:[%s2834_s3 + $0x1c] sm:$0x1] %v1376_v58  ;;  %v1370_v10 = vsel %vm2216_vm10, 0, %v1369_v52  ;;  %v1317_v14 = vld [vmem:[%s2834_s3 + $0x20] sm:$0x1]  ;;  %v1235_v18 = vsel %vm2156_vm6, %v1085_v24, %v1545_v29  ;;  %v1238_v20 = vsel %vm2189_vm9, %v1086_v50, %v1547_v41  ;;  %v1223_v28 = vsel %vm2156_vm6, %v1069_v36, %v1537_v37  ;;  %v587_v13 = vpop.f32.mrb[13].mxu1 }
 0x128   :  { %v1378_v17 = vld [vmem:[%s2834_s3 + $0x24] sm:$0x1]  ;;  %1310 = vst [vmem:[%s2834_s3 + $0x8] sm:$0x1] %v1309_v5  ;;  %1371 = vst [vmem:[%s2834_s3 + $0xc] sm:$0x1] %v1370_v10  ;;  %v1226_v30 = vsel %vm2189_vm9, %v1070_v53, %v1539_v27  ;;  %v960_v3 = vadd.f32 %v1724_v40, %v2270_v11  ;;  %v1725_v7 = vadd.f32 %v2294_v4, %v1675_v1 }
 0x129   :  { %v1318_v22 = vsel %vm2189_vm9, 0, %v1317_v14  ;;  %v1379_v25 = vsel %vm2216_vm10, 0, %v1378_v17  ;;  %v1311_v63 = vld [vmem:[%s2834_s3 + $0x10] sm:$0x1]  ;;  %v1372_v26 = vld [vmem:[%s2834_s3 + $0x14] sm:$0x1]  ;;  %v1726_v29 = vadd.f32 %v2300_v61, %v587_v13 }
 0x12a   :  { %1546 = vst [vmem:[%s2834_s3 + $0x38] sm:$0xf] %v1235_v18  ;;  %1548 = vst [vmem:[%s2834_s3 + $0x3c] sm:$0x1] %v1238_v20  ;;  %v1312_v21 = vsel %vm2189_vm9, 0, %v1311_v63  ;;  %v1373_v35 = vsel %vm2216_vm10, 0, %v1372_v26  ;;  %v965_v63 = vadd.f32 %v1725_v7, %v2270_v11 }
 0x12b   :  { %1319 = vst [vmem:[%s2834_s3 + $0x20] sm:$0x1] %v1318_v22  ;;  %1380 = vst [vmem:[%s2834_s3 + $0x24] sm:$0x1] %v1379_v25  ;;  %v1088_v56 = vshrl.u32 %v1596_v62, 16  ;;  %v1091_v32 = vshll.u32 %v1596_v62, 16  ;;  %v963_v26 = vadd.f32 %v1726_v29, %v2270_v11 }
 0x12c   :  { %1538 = vst [vmem:[%s2834_s3 + $0x28] sm:$0xf] %v1223_v28  ;;  %1540 = vst [vmem:[%s2834_s3 + $0x2c] sm:$0x1] %v1226_v30  ;;  %v1072_v15 = vshrl.u32 %v1594_v23, 16  ;;  %v1075_v6 = vshll.u32 %v1594_v23, 16 }
 0x12d   :  { %1313 = vst [vmem:[%s2834_s3 + $0x10] sm:$0x1] %v1312_v21  ;;  %1374 = vst [vmem:[%s2834_s3 + $0x14] sm:$0x1] %v1373_v35  ;;  %v977_v33 = vmax.f32 %v961_v45, 0.0  ;;  %v975_v57 = vmax.f32 %v959_v49, 0.0 }
 0x12e   :  { %v1090_v39 = vrot.slane %v1088_v56, 7  ;;  %v2470_v48 = vpop.f32.mrb[14].mxu1  ;;  %v1551_v19 = vld [vmem:[%s2834_s3 + $0x44] sm:$0x1]  ;;  %v1074_v8 = vrot.slane %v1072_v15, 7  ;;  %v978_v40 = vmax.f32 %v962_v2, 0.0 }
 0x12f   :  { %v1599_v55 = vpack.c.bf16 %v977_v33, %v977_v33  ;;  %v1597_v38 = vpack.c.bf16 %v975_v57, %v975_v57  ;;  %v2479_v41 = vpop.f32.mrb[15].mxu1  ;;  %v1543_v4 = vld [vmem:[%s2834_s3 + $0x34] sm:$0x1]  ;;  %v976_v37 = vmax.f32 %v960_v3, 0.0  ;;  %v1561_v10 = vld [vmem:[%s2834_s3 + $0x68] sm:$0xf]  ;;  %v1727_v29 = vadd.f32 %v2305_v0, %v2470_v48 }
 0x130   :  { %v1093_v46 = vor.u32 %v1091_v32, %v1090_v39  ;;  %v1094_v51 = vrot.slane %v1090_v39, 4  ;;  %v1077_v27 = vor.u32 %v1075_v6, %v1074_v8  ;;  %v1078_v47 = vrot.slane %v1074_v8, 4  ;;  %v1563_v17 = vld [vmem:[%s2834_s3 + $0x6c] sm:$0x1]  ;;  %v1553_v18 = vld [vmem:[%s2834_s3 + $0x58] sm:$0xf] }
 0x131   :  { %v1112_v43 = vshrl.u32 %v1599_v55, 16  ;;  %v1115_v45 = vshll.u32 %v1599_v55, 16  ;;  %v1326_v49 = vld [vmem:[%s2834_s3 + $0x38] sm:$0x1]  ;;  %v1387_v61 = vld [vmem:[%s2834_s3 + $0x3c] sm:$0x1]  ;;  %v1600_v22 = vpack.c.bf16 %v978_v40, %v978_v40  ;;  %v1598_v25 = vpack.c.bf16 %v976_v37, %v976_v37 }
 0x132   :  { %v1241_v16 = vsel %vm2156_vm6, %v1093_v46, %v1549_v42  ;;  %v1244_v31 = vsel %vm2189_vm9, %v1094_v51, %v1551_v19  ;;  %v1096_v24 = vshrl.u32 %v1597_v38, 16  ;;  %v1099_v50 = vshll.u32 %v1597_v38, 16  ;;  %v1555_v20 = vld [vmem:[%s2834_s3 + $0x5c] sm:$0x1]  ;;  %v1565_v39 = vld [vmem:[%s2834_s3 + $0x70] sm:$0xf] }
 0x133   :  { %v1327_v36 = vsel %vm2189_vm9, 0, %v1326_v49  ;;  %v1388_v53 = vsel %vm2216_vm10, 0, %v1387_v61  ;;  %v1320_v54 = vld [vmem:[%s2834_s3 + $0x28] sm:$0x1]  ;;  %v1381_v58 = vld [vmem:[%s2834_s3 + $0x2c] sm:$0x1]  ;;  %v1229_v59 = vsel %vm2156_vm6, %v1077_v27, %v1541_v9  ;;  %v1232_v52 = vsel %vm2189_vm9, %v1078_v47, %v1543_v4 }
 0x134   :  { %1550 = vst [vmem:[%s2834_s3 + $0x40] sm:$0xf] %v1241_v16  ;;  %1552 = vst [vmem:[%s2834_s3 + $0x44] sm:$0x1] %v1244_v31  ;;  %v1321_v62 = vsel %vm2189_vm9, 0, %v1320_v54  ;;  %v1382_v23 = vsel %vm2216_vm10, 0, %v1381_v58  ;;  %v1728_v46 = vadd.f32 %v2310_v12, %v2479_v41 }
 0x135   :  { %1328 = vst [vmem:[%s2834_s3 + $0x38] sm:$0x1] %v1327_v36  ;;  %1389 = vst [vmem:[%s2834_s3 + $0x3c] sm:$0x1] %v1388_v53  ;;  %v1114_v5 = vrot.slane %v1112_v43, 7  ;;  %v1098_v14 = vrot.slane %v1096_v24, 7  ;;  %v966_v24 = vadd.f32 %v1727_v29, %v2270_v11 }
 0x136   :  { %1542 = vst [vmem:[%s2834_s3 + $0x30] sm:$0xf] %v1229_v59  ;;  %1544 = vst [vmem:[%s2834_s3 + $0x34] sm:$0x1] %v1232_v52  ;;  %v1120_v56 = vshrl.u32 %v1600_v22, 16  ;;  %v1123_v32 = vshll.u32 %v1600_v22, 16 }
 0x137   :  { %1322 = vst [vmem:[%s2834_s3 + $0x28] sm:$0x1] %v1321_v62  ;;  %1383 = vst [vmem:[%s2834_s3 + $0x2c] sm:$0x1] %v1382_v23  ;;  %v1117_v28 = vor.u32 %v1115_v45, %v1114_v5  ;;  %v1118_v30 = vrot.slane %v1114_v5, 4  ;;  %v1101_v21 = vor.u32 %v1099_v50, %v1098_v14  ;;  %v1102_v35 = vrot.slane %v1098_v14, 4 }
 0x138   :  { %v1104_v1 = vshrl.u32 %v1598_v25, 16  ;;  %v1107_v15 = vshll.u32 %v1598_v25, 16  ;;  %v1122_v42 = vrot.slane %v1120_v56, 7  ;;  %v1567_v2 = vld [vmem:[%s2834_s3 + $0x74] sm:$0x1]  ;;  %v981_v19 = vmax.f32 %v965_v63, 0.0 }
 0x139   :  { %v1259_v6 = vsel %vm2156_vm6, %v1117_v28, %v1561_v10  ;;  %v1262_v33 = vsel %vm2189_vm9, %v1118_v30, %v1563_v17  ;;  %v1247_v57 = vsel %vm2156_vm6, %v1101_v21, %v1553_v18  ;;  %v1250_v13 = vsel %vm2189_vm9, %v1102_v35, %v1555_v20  ;;  %v1557_v7 = vld [vmem:[%s2834_s3 + $0x60] sm:$0xf]  ;;  %v1559_v38 = vld [vmem:[%s2834_s3 + $0x64] sm:$0x1]  ;;  %v1577_v62 = vld [vmem:[%s2834_s3 + $0x88] sm:$0xf] }
 0x13a   :  { %1562 = vst [vmem:[%s2834_s3 + $0x68] sm:$0xf] %v1259_v6  ;;  %1564 = vst [vmem:[%s2834_s3 + $0x6c] sm:$0x1] %v1262_v33  ;;  %v1106_v3 = vrot.slane %v1104_v1, 7  ;;  %v979_v8 = vmax.f32 %v963_v26, 0.0  ;;  %v1125_v27 = vor.u32 %v1123_v32, %v1122_v42  ;;  %v1603_v49 = vpack.c.bf16 %v981_v19, %v981_v19 }
 0x13b   :  { %1554 = vst [vmem:[%s2834_s3 + $0x58] sm:$0xf] %v1247_v57  ;;  %1556 = vst [vmem:[%s2834_s3 + $0x5c] sm:$0x1] %v1250_v13  ;;  %v1329_v9 = vld [vmem:[%s2834_s3 + $0x40] sm:$0x1]  ;;  %v964_v50 = vadd.f32 %v1728_v46, %v2270_v11 }
 0x13c   :  { %v1390_v55 = vld [vmem:[%s2834_s3 + $0x44] sm:$0x1]  ;;  %v1330_v51 = vsel %vm2189_vm9, 0, %v1329_v9  ;;  %v1109_v47 = vor.u32 %v1107_v15, %v1106_v3  ;;  %v1126_v48 = vrot.slane %v1122_v42, 4  ;;  %v1110_v41 = vrot.slane %v1106_v3, 4 }
 0x13d   :  { %v1391_v4 = vsel %vm2216_vm10, 0, %v1390_v55  ;;  %v1323_v40 = vld [vmem:[%s2834_s3 + $0x30] sm:$0x1]  ;;  %v1384_v37 = vld [vmem:[%s2834_s3 + $0x34] sm:$0x1]  ;;  %v1265_v43 = vsel %vm2156_vm6, %v1125_v27, %v1565_v39  ;;  %v1601_v61 = vpack.c.bf16 %v979_v8, %v979_v8  ;;  %v1144_v36 = vshrl.u32 %v1603_v49, 16 }
 0x13e   :  { %1331 = vst [vmem:[%s2834_s3 + $0x40] sm:$0x1] %v1330_v51  ;;  %1392 = vst [vmem:[%s2834_s3 + $0x44] sm:$0x1] %v1391_v4  ;;  %v1324_v0 = vsel %vm2189_vm9, 0, %v1323_v40  ;;  %v1385_v12 = vsel %vm2216_vm10, 0, %v1384_v37  ;;  %v1253_v45 = vsel %vm2156_vm6, %v1109_v47, %v1557_v7  ;;  %v1268_v16 = vsel %vm2189_vm9, %v1126_v48, %v1567_v2 }
 0x13f   :  { %1325 = vst [vmem:[%s2834_s3 + $0x30] sm:$0x1] %v1324_v0  ;;  %1386 = vst [vmem:[%s2834_s3 + $0x34] sm:$0x1] %v1385_v12  ;;  %v1256_v31 = vsel %vm2189_vm9, %v1110_v41, %v1559_v38  ;;  %v1147_v53 = vshll.u32 %v1603_v49, 16  ;;  %v1128_v54 = vshrl.u32 %v1601_v61, 16 }
 0x140   :  { %1566 = vst [vmem:[%s2834_s3 + $0x70] sm:$0xf] %v1265_v43  ;;  %1558 = vst [vmem:[%s2834_s3 + $0x60] sm:$0xf] %v1253_v45  ;;  %v1131_v58 = vshll.u32 %v1601_v61, 16  ;;  %v1146_v17 = vrot.slane %v1144_v36, 7 }
 0x141   :  { %1568 = vst [vmem:[%s2834_s3 + $0x74] sm:$0x1] %v1268_v16  ;;  %1560 = vst [vmem:[%s2834_s3 + $0x64] sm:$0x1] %v1256_v31  ;;  %v1344_v59 = vld [vmem:[%s2834_s3 + $0x68] sm:$0x1] }
 0x142   :  { %v1405_v11 = vld [vmem:[%s2834_s3 + $0x6c] sm:$0x1]  ;;  %v1338_v52 = vld [vmem:[%s2834_s3 + $0x58] sm:$0x1]  ;;  %v1345_v23 = vsel %vm2189_vm9, 0, %v1344_v59  ;;  %v1130_v22 = vrot.slane %v1128_v54, 7  ;;  %v1149_v26 = vor.u32 %v1147_v53, %v1146_v17 }
 0x143   :  { %v1406_v5 = vsel %vm2216_vm10, 0, %v1405_v11  ;;  %v1339_v10 = vsel %vm2189_vm9, 0, %v1338_v52  ;;  %v1399_v14 = vld [vmem:[%s2834_s3 + $0x5c] sm:$0x1]  ;;  %1346 = vst [vmem:[%s2834_s3 + $0x68] sm:$0x1] %v1345_v23 }
 0x144   :  { %1407 = vst [vmem:[%s2834_s3 + $0x6c] sm:$0x1] %v1406_v5  ;;  %1340 = vst [vmem:[%s2834_s3 + $0x58] sm:$0x1] %v1339_v10  ;;  %v1400_v18 = vsel %vm2216_vm10, 0, %v1399_v14  ;;  %v982_v25 = vmax.f32 %v966_v24, 0.0  ;;  %v1133_v35 = vor.u32 %v1131_v58, %v1130_v22  ;;  %v1283_v33 = vsel %vm2156_vm6, %v1149_v26, %v1577_v62 }
 0x145   :  { %v1579_v20 = vld [vmem:[%s2834_s3 + $0x8c] sm:$0x1]  ;;  %v980_v63 = vmax.f32 %v964_v50, 0.0  ;;  %1401 = vst [vmem:[%s2834_s3 + $0x5c] sm:$0x1] %v1400_v18  ;;  %v1150_v28 = vrot.slane %v1146_v17, 4 }
 0x146   :  { %v1569_v30 = vld [vmem:[%s2834_s3 + $0x78] sm:$0xf]  ;;  %v1571_v21 = vld [vmem:[%s2834_s3 + $0x7c] sm:$0x1]  ;;  %v1134_v56 = vrot.slane %v1130_v22, 4  ;;  %v1604_v32 = vpack.c.bf16 %v982_v25, %v982_v25 }
 0x147   :  { %v1602_v1 = vpack.c.bf16 %v980_v63, %v980_v63  ;;  %v1347_v15 = vld [vmem:[%s2834_s3 + $0x70] sm:$0x1]  ;;  %v1341_v6 = vld [vmem:[%s2834_s3 + $0x60] sm:$0x1]  ;;  %v1286_v57 = vsel %vm2189_vm9, %v1150_v28, %v1579_v20  ;;  %1578 = vst [vmem:[%s2834_s3 + $0x88] sm:$0xf] %v1283_v33  ;;  %v1271_v3 = vsel %vm2156_vm6, %v1133_v35, %v1569_v30 }
 0x148   :  { %v1348_v13 = vsel %vm2189_vm9, 0, %v1347_v15  ;;  %v1408_v39 = vld [vmem:[%s2834_s3 + $0x74] sm:$0x1]  ;;  %v1342_v42 = vsel %vm2189_vm9, 0, %v1341_v6  ;;  %v1402_v2 = vld [vmem:[%s2834_s3 + $0x64] sm:$0x1]  ;;  %v1274_v7 = vsel %vm2189_vm9, %v1134_v56, %v1571_v21 }
 0x149   :  { %1580 = vst [vmem:[%s2834_s3 + $0x8c] sm:$0x1] %v1286_v57  ;;  %1349 = vst [vmem:[%s2834_s3 + $0x70] sm:$0x1] %v1348_v13  ;;  %v1409_v19 = vsel %vm2216_vm10, 0, %v1408_v39  ;;  %v1403_v8 = vsel %vm2216_vm10, 0, %v1402_v2 }
 0x14a   :  { %1343 = vst [vmem:[%s2834_s3 + $0x60] sm:$0x1] %v1342_v42  ;;  %1570 = vst [vmem:[%s2834_s3 + $0x78] sm:$0xf] %v1271_v3  ;;  %v1152_v9 = vshrl.u32 %v1604_v32, 16  ;;  %v1136_v55 = vshrl.u32 %v1602_v1, 16 }
 0x14b   :  { %1572 = vst [vmem:[%s2834_s3 + $0x7c] sm:$0x1] %v1274_v7  ;;  %1410 = vst [vmem:[%s2834_s3 + $0x74] sm:$0x1] %v1409_v19  ;;  %v1155_v29 = vshll.u32 %v1604_v32, 16  ;;  %v1139_v40 = vshll.u32 %v1602_v1, 16 }
 0x14c   :  { %1404 = vst [vmem:[%s2834_s3 + $0x64] sm:$0x1] %v1403_v8  ;;  %v1154_v38 = vrot.slane %v1152_v9, 7  ;;  %v1581_v46 = vld [vmem:[%s2834_s3 + $0x90] sm:$0xf]  ;;  %v1138_v4 = vrot.slane %v1136_v55, 7 }
 0x14d   :  { %v1583_v51 = vld [vmem:[%s2834_s3 + $0x94] sm:$0x1]  ;;  %v1573_v47 = vld [vmem:[%s2834_s3 + $0x80] sm:$0xf]  ;;  %v1575_v0 = vld [vmem:[%s2834_s3 + $0x84] sm:$0x1] }
 0x14e   :  { %v1157_v37 = vor.u32 %v1155_v29, %v1154_v38  ;;  %v1158_v27 = vrot.slane %v1154_v38, 4  ;;  %v1141_v12 = vor.u32 %v1139_v40, %v1138_v4  ;;  %v1142_v48 = vrot.slane %v1138_v4, 4  ;;  %v1356_v41 = vld [vmem:[%s2834_s3 + $0x88] sm:$0x1] }
 0x14f   :  { %v1357_v61 = vsel %vm2189_vm9, 0, %v1356_v41 }
 0x150   :  { %v1417_v43 = vld [vmem:[%s2834_s3 + $0x8c] sm:$0x1]  ;;  %v1289_v45 = vsel %vm2156_vm6, %v1157_v37, %v1581_v46  ;;  %v1292_v49 = vsel %vm2189_vm9, %v1158_v27, %v1583_v51  ;;  %v1277_v50 = vsel %vm2156_vm6, %v1141_v12, %v1573_v47  ;;  %v1280_v36 = vsel %vm2189_vm9, %v1142_v48, %v1575_v0  ;;  %1358 = vst [vmem:[%s2834_s3 + $0x88] sm:$0x1] %v1357_v61 }
 0x151   :  { %v1418_v16 = vsel %vm2216_vm10, 0, %v1417_v43  ;;  %v1350_v31 = vld [vmem:[%s2834_s3 + $0x78] sm:$0x1]  ;;  %1582 = vst [vmem:[%s2834_s3 + $0x90] sm:$0xf] %v1289_v45 }
 0x152   :  { %v1411_v24 = vld [vmem:[%s2834_s3 + $0x7c] sm:$0x1]  ;;  %1584 = vst [vmem:[%s2834_s3 + $0x94] sm:$0x1] %v1292_v49  ;;  %1419 = vst [vmem:[%s2834_s3 + $0x8c] sm:$0x1] %v1418_v16 }
 0x153   :  { %v1351_v53 = vsel %vm2189_vm9, 0, %v1350_v31  ;;  %v1412_v54 = vsel %vm2216_vm10, 0, %v1411_v24  ;;  %1574 = vst [vmem:[%s2834_s3 + $0x80] sm:$0xf] %v1277_v50  ;;  %1576 = vst [vmem:[%s2834_s3 + $0x84] sm:$0x1] %v1280_v36 }
 0x154   :  { %1352 = vst [vmem:[%s2834_s3 + $0x78] sm:$0x1] %v1351_v53  ;;  %1413 = vst [vmem:[%s2834_s3 + $0x7c] sm:$0x1] %v1412_v54 }
 0x158   :  { %v1359_v60 = vld [vmem:[%s2834_s3 + $0x90] sm:$0x1] }
 0x159   :  { %v1420_v58 = vld [vmem:[%s2834_s3 + $0x94] sm:$0x1]  ;;  %v1360_v59 = vsel %vm2189_vm9, 0, %v1359_v60 }
 0x15a   :  { %v1421_v11 = vsel %vm2216_vm10, 0, %v1420_v58  ;;  %v1353_v52 = vld [vmem:[%s2834_s3 + $0x80] sm:$0x1]  ;;  %v1414_v62 = vld [vmem:[%s2834_s3 + $0x84] sm:$0x1] }
 0x15b   :  { %1361 = vst [vmem:[%s2834_s3 + $0x90] sm:$0x1] %v1360_v59  ;;  %1422 = vst [vmem:[%s2834_s3 + $0x94] sm:$0x1] %v1421_v11  ;;  %v1354_v23 = vsel %vm2189_vm9, 0, %v1353_v52  ;;  %v1415_v5 = vsel %vm2216_vm10, 0, %v1414_v62 }
 0x15c   :  { %1355 = vst [vmem:[%s2834_s3 + $0x80] sm:$0x1] %v1354_v23  ;;  %1416 = vst [vmem:[%s2834_s3 + $0x84] sm:$0x1] %v1415_v5 }

// kernel: qbasicblock_forward.3
= control target key start
LH: loop header
LB: loop body
LE: loop exit
PB: predicated region body
PF: predicated region fallthrough
CT: control target
= control target key end

     0   :  { %vm343_vm0 = vcmask 1043456   ;;  %vm318_vm1 = vcmask 64512   ;;  %vm624_vm2 = vcmask 1042432   ;;  %vm625_vm3 = vcmask 1046532   ;;  %s3606_s1 = inlined_call_operand.vmem [shape: bf16[9,8,8], index: 1, kind: input, shape index: {}]   ;;  %s3607_s0 = inlined_call_operand.vmem [shape: bf16[2,10,10,8], index: 0, kind: input, shape index: {}]   ;;  %s3608_s3 = inlined_call_operand.vmem [shape: bf16[2,8,8,4], index: 3, kind: input, shape index: {}]   ;;  %s3609_s4 = inlined_call_operand.vmem [shape: bf16[4,8], index: 4, kind: input, shape index: {}]   ;;  %s3610_s2 = inlined_call_operand.vmem [shape: f32[1,8], index: 2, kind: input, shape index: {}]   ;;  %s3611_s5 = inlined_call_operand.vmem [shape: f32[1,8], index: 5, kind: input, shape index: {}]   ;;  %s3612_s6 = inlined_call_operand.vmem [shape: f32[8,128], index: 6, kind: output, shape index: {}]  }
   0x1   :  { %v2177_v0 = vld [vmem:[%s3606_s1 + $0x14] sm:$0xf]  ;;  %v2754_v1 = vld [vmem:[%s3607_s0] sm:$0xf]  ;;  %v25_v3 = vld [vmem:[%s3607_s0 + $0x4] sm:$0x1] }
   0x2   :  { %2682 = vmatprep.subr.msk.bf16.mxu0 %vm343_vm0, %v2177_v0  ;;  %v1238_v2 = vsel %vm343_vm0, %v2177_v0, 0  ;;  %v2764_v4 = vld [vmem:[%s3607_s0 + $0x8] sm:$0xf]  ;;  %v27_v5 = vld [vmem:[%s3607_s0 + $0xc] sm:$0x1]  ;;  %v2108_v6 = vrot.slane %v2754_v1, 9  ;;  %vm2805_vm4 = vmor %vm624_vm2, %vm625_vm3 }
   0x3   :  { %3637 = vst [vmem:[#allocation2_spill] sm:$0xff] %v2764_v4  ;;  %2428 = vmatpush3.bf16.msra.mxu0 %v1238_v2  ;;  %v2773_v7 = vld [vmem:[%s3607_s0 + $0x10] sm:$0xf]  ;;  %v29_v8 = vld [vmem:[%s3607_s0 + $0x14] sm:$0x1]  ;;  %v629_v19 = vrot.slane %v25_v3, 5 }
   0x4   :  { %3638 = vst [vmem:[#allocation3_spill] sm:$0xff] %v2773_v7  ;;  %v2781_v9 = vld [vmem:[%s3607_s0 + $0x18] sm:$0xf]  ;;  %v31_v10 = vld [vmem:[%s3607_s0 + $0x1c] sm:$0x1]  ;;  %v106_v15 = vshll.u32 %v29_v8, 16 }
   0x5   :  { %3639 = vst [vmem:[#allocation4_spill] sm:$0xff] %v2781_v9  ;;  %v2789_v11 = vld [vmem:[%s3607_s0 + $0x20] sm:$0xf]  ;;  %v2794_v12 = vld [vmem:[%s3607_s0 + $0x24] sm:$0x1]  ;;  %v2798_v13 = vcombine.low %v2773_v7, %v2781_v9  ;;  %v120_v16 = vshll.u32 %v31_v10, 16  ;;  %v2817_v25 = vsel %vm2805_vm4, %v2108_v6, %v629_v19 }
   0x6   :  { %3640 = vst [vmem:[#allocation5_spill] sm:$0xff] %v2789_v11  ;;  %v134_v17 = vshll.u32 %v2794_v12, 16  ;;  %v2075_v20 = vld [vmem:[%s3606_s1 + $0x4] sm:$0xf]  ;;  %v2109_v21 = vrot.slane %v2764_v4, 9  ;;  %v633_v22 = vrot.slane %v27_v5, 5 }
   0x7   :  { %v2110_v23 = vrot.slane %v2773_v7, 9  ;;  %v637_v24 = vrot.slane %v29_v8, 5  ;;  %2677 = vmatprep.subr.msk.bf16.mxu1 %vm343_vm0, %v2075_v20  ;;  %3643 = vst [vmem:[#allocation6_spill] sm:$0xff] %v2817_v25  ;;  %v2111_v26 = vrot.slane %v2781_v9, 9  ;;  %v641_v27 = vrot.slane %v31_v10, 5 }
   0x8   :  { %v2112_v28 = vrot.slane %v2789_v11, 9  ;;  %v64_v29 = vld [vmem:[%s3606_s1] sm:$0xf]  ;;  %v2826_v30 = vsel %vm2805_vm4, %v2109_v21, %v633_v22  ;;  %v645_v32 = vrot.slane %v2794_v12, 5  ;;  %v345_v33 = vsel %vm343_vm0, %v2075_v20, 0 }
   0x9   :  { %3644 = vst [vmem:[#allocation7_spill] sm:$0xff] %v2826_v30  ;;  %v638_v31 = vsel %vm2805_vm4, %v2110_v23, %v637_v24  ;;  %v642_v34 = vsel %vm2805_vm4, %v2111_v26, %v641_v27  ;;  %2338 = vmatpush3.bf16.msra.mxu1 %v345_v33  ;;  %vm65_vm5 = vsmask.f32 3328  ;;  %v2840_v37 = vld [vmem:[%s3606_s1 + $0x18] sm:$0xf]  ;;  %v69_v40 = vshrl.u32 %v2754_v1, 16 }
   0xa   :  { %v2178_v36 = vcombine.low %v2826_v30, %v638_v31  ;;  %v2844_v38 = vsel %vm2805_vm4, %v2112_v28, %v645_v32  ;;  %v2846_v39 = vcombine.low %v638_v31, %v642_v34  ;;  %vm66_vm6 = vsmask.f32 7440  ;;  %2678 = vmatprep.subr.msk.bf16.mxu1 %vm343_vm0, %v64_v29  ;;  %2683 = vmatprep.subr.msk.bf16.mxu0 %vm343_vm0, %v2840_v37  ;;  %v2883_v22 = vld [vmem:[%s3607_s0 + $0x30] sm:$0xf]  ;;  %v37_v28 = vld [vmem:[%s3607_s0 + $0x34] sm:$0x1] }
   0xb   :  { %v2179_v41 = vcombine.low %v642_v34, %v2844_v38  ;;  %v72_v42 = vshll.u32 %v2754_v1, 16  ;;  %v78_v43 = vshll.u32 %v25_v3, 16  ;;  %v83_v44 = vshrl.u32 %v2764_v4, 16  ;;  %vm2864_vm7 = vmor %vm65_vm5, %vm66_vm6  ;;  %v2873_v3 = vld [vmem:[%s3607_s0 + $0x28] sm:$0xf] }
   0xc   :  { %3645 = vst [vmem:[#allocation8_spill] sm:$0xff] %v2846_v39  ;;  %2429 = vmatprep.mubr.msk.bf16.mxu0 %vm318_vm1, %v2178_v36  ;;  %v71_v45 = vrot.slane %v69_v40, 4  ;;  %v86_v46 = vshll.u32 %v2764_v4, 16  ;;  %v92_v47 = vshll.u32 %v27_v5, 16  ;;  %v97_v48 = vshrl.u32 %v2773_v7, 16 }
   0xd   :  { %2430 = vmatmul.mubr.msk.bf16.vlgmr.msra.gmra.mrb[0].mxu0 %vm318_vm1, %v2179_v41  ;;  %v74_v49 = vrot.slane %v72_v42, 5  ;;  %v80_v50 = vrot.slane %v78_v43, 5  ;;  %v85_v51 = vrot.slane %v83_v44, 4  ;;  %v100_v52 = vshll.u32 %v2773_v7, 16  ;;  %v2894_v12 = vld [vmem:[%s3607_s0 + $0x38] sm:$0xf] }
   0xe   :  { %v88_v53 = vrot.slane %v86_v46, 5  ;;  %v94_v54 = vrot.slane %v92_v47, 5  ;;  %v99_v55 = vrot.slane %v97_v48, 4  ;;  %v108_v56 = vrot.slane %v106_v15, 5  ;;  %v35_v15 = vld [vmem:[%s3607_s0 + $0x2c] sm:$0x1] }
   0xf   :  { %v75_v57 = vor.u32 %v74_v49, %v71_v45  ;;  %v102_v58 = vrot.slane %v100_v52, 5  ;;  %v111_v59 = vshrl.u32 %v2781_v9, 16  ;;  %v114_v60 = vshll.u32 %v2781_v9, 16  ;;  %v2909_v34 = vld [vmem:[%s3607_s0 + $0x40] sm:$0xf] }
  0x10   :  { %v89_v62 = vor.u32 %v88_v53, %v85_v51  ;;  %v122_v63 = vrot.slane %v120_v16, 5  ;;  %v125_v0 = vshrl.u32 %v2789_v11, 16  ;;  %v128_v2 = vshll.u32 %v2789_v11, 16  ;;  %v2920_v43 = vld [vmem:[%s3607_s0 + $0x44] sm:$0x1] }
  0x11   :  { %v76_v5 = vrot.slane %v75_v57, 4  ;;  %v103_v6 = vor.u32 %v102_v58, %v99_v55  ;;  %v113_v8 = vrot.slane %v111_v59, 4  ;;  %v116_v10 = vrot.slane %v114_v60, 5  ;;  %v2962_v60 = vld [vmem:[%s3607_s0 + $0x58] sm:$0xf] }
  0x12   :  { %v90_v19 = vrot.slane %v89_v62, 4  ;;  %v127_v20 = vrot.slane %v125_v0, 4  ;;  %v130_v16 = vrot.slane %v128_v2, 5  ;;  %v136_v21 = vrot.slane %v134_v17, 5  ;;  %v3140_v7 = vld [vmem:[%s3607_s0 + $0x90] sm:$0xf] }
  0x13   :  { %v81_v23 = vsel %vm2864_vm7, %v76_v5, %v80_v50  ;;  %v104_v24 = vrot.slane %v103_v6, 4  ;;  %v117_v26 = vor.u32 %v116_v10, %v113_v8  ;;  %v509_v27 = vsel %vm343_vm0, %v64_v29, 0  ;;  %v2904_v29 = vld [vmem:[%s3607_s0 + $0x3c] sm:$0x1]  ;;  %v2980_v5 = vld [vmem:[%s3607_s0 + $0x60] sm:$0xf] }
  0x14   :  { %v2898_v17 = vsel %vm2864_vm7, %v90_v19, %v94_v54  ;;  %v131_v31 = vor.u32 %v130_v16, %v127_v20  ;;  %v2113_v32 = vrot.slane %v2873_v3, 9  ;;  %v649_v33 = vrot.slane %v35_v15, 5  ;;  %v2985_v6 = vld [vmem:[%s3606_s1 + $0x8] sm:$0xf]  ;;  %v2995_v20 = vld [vmem:[%s3607_s0 + $0x64] sm:$0x1] }
  0x15   :  { %3648 = vst [vmem:[#allocation9_spill] sm:$0xff] %v2898_v17  ;;  %v2913_v36 = vsel %vm2864_vm7, %v104_v24, %v108_v56  ;;  %v118_v40 = vrot.slane %v117_v26, 4  ;;  %v2076_v41 = vcombine.low %v81_v23, %v2898_v17  ;;  %v2114_v42 = vrot.slane %v2883_v22, 9  ;;  %v3000_v16 = vld [vmem:[%s3606_s1 + $0x1c] sm:$0xf] }
  0x16   :  { %3649 = vst [vmem:[#allocation10_spill] sm:$0xff] %v2913_v36  ;;  %v132_v44 = vrot.slane %v131_v31, 4  ;;  %v2926_v46 = vsel %vm2805_vm4, %v2113_v32, %v649_v33  ;;  %v653_v47 = vrot.slane %v37_v28, 5  ;;  %v2115_v49 = vrot.slane %v2894_v12, 9 }
  0x17   :  { %v2930_v48 = vsel %vm2864_vm7, %v118_v40, %v122_v63  ;;  %2339 = vmatprep.mubr.msk.bf16.mxu1 %vm318_vm1, %v2076_v41  ;;  %v657_v50 = vrot.slane %v2904_v29, 5  ;;  %v2175_v51 = vrot.slane %v2909_v34, 9  ;;  %v1195_v55 = vrot.slane %v2920_v43, 5  ;;  %v3017_v40 = vld [vmem:[%s3607_s0 + $0x6c] sm:$0x1] }
  0x18   :  { %3650 = vst [vmem:[#allocation11_spill] sm:$0xff] %v2930_v48  ;;  %v2938_v52 = vsel %vm2864_vm7, %v132_v44, %v136_v21  ;;  %v2942_v53 = vcombine.low %v2913_v36, %v2930_v48  ;;  %v2946_v54 = vsel %vm2805_vm4, %v2114_v42, %v653_v47  ;;  %v1368_v59 = vsel %vm343_vm0, %v2840_v37, 0  ;;  %v2975_v37 = vld [vmem:[%s3607_s0 + $0x5c] sm:$0x1]  ;;  %v3133_v36 = vld [vmem:[%s3607_s0 + $0x8c] sm:$0x1] }
  0x19   :  { %3651 = vst [vmem:[#allocation12_spill] sm:$0xff] %v2938_v52  ;;  %v2180_v57 = vcombine.low %v2926_v46, %v2946_v54  ;;  %v2955_v58 = vsel %vm2805_vm4, %v2115_v49, %v657_v50  ;;  %v2968_v62 = vsel %vm2805_vm4, %v2175_v51, %v1195_v55  ;;  %2446 = vmatpush3.bf16.msra.mxu0 %v1368_v59  ;;  %v139_v63 = vshrl.u32 %v2873_v3, 16  ;;  %v3024_v49 = vld [vmem:[%s3607_s0 + $0x70] sm:$0xf]  ;;  %v3031_v59 = vld [vmem:[%s3607_s0 + $0x74] sm:$0x1] }
  0x1a   :  { %3652 = vst [vmem:[#allocation13_spill] sm:$0xff] %v2942_v53  ;;  %2340 = vmatmul.mubr.msk.bf16.vlgmr.msra.gmra.mrb[0].mxu1 %vm318_vm1, %v2942_v53  ;;  %v142_v0 = vshll.u32 %v2873_v3, 16  ;;  %v148_v2 = vshll.u32 %v35_v15, 16  ;;  %v2181_v8 = vcombine.low %v2955_v58, %v2968_v62  ;;  %v153_v10 = vshrl.u32 %v2883_v22, 16  ;;  %2684 = vmatprep.subr.msk.bf16.mxu0 %vm343_vm0, %v3000_v16 }
  0x1b   :  { %2356 = vmatpush3.bf16.msra.mxu1 %v509_v27  ;;  %2433 = vmatprep.mubr.msk.bf16.mxu0 %vm318_vm1, %v2180_v57  ;;  %v156_v15 = vshll.u32 %v2883_v22, 16  ;;  %v162_v19 = vshll.u32 %v37_v28, 16  ;;  %v141_v21 = vrot.slane %v139_v63, 4  ;;  %v167_v26 = vshrl.u32 %v2894_v12, 16  ;;  %v3006_v27 = vld [vmem:[%s3607_s0 + $0x68] sm:$0xf] }
  0x1c   :  { %v144_v23 = vrot.slane %v142_v0, 5  ;;  %v150_v24 = vrot.slane %v148_v2, 5  ;;  %2679 = vmatprep.subr.msk.bf16.mxu1 %vm343_vm0, %v2985_v6  ;;  %2434 = vmatmul.mubr.msk.bf16.gmra.mrb[4].mxu0 %vm318_vm1, %v2181_v8  ;;  %v155_v28 = vrot.slane %v153_v10, 4  ;;  %v170_v33 = vshll.u32 %v2894_v12, 16 }
  0x1d   :  { %v158_v31 = vrot.slane %v156_v15, 5  ;;  %v164_v32 = vrot.slane %v162_v19, 5  ;;  %v169_v42 = vrot.slane %v167_v26, 4  ;;  %v176_v44 = vshll.u32 %v2904_v29, 16 }
  0x1e   :  { %v145_v41 = vor.u32 %v144_v23, %v141_v21  ;;  %v2117_v47 = vrot.slane %v2962_v60, 9  ;;  %v172_v51 = vrot.slane %v170_v33, 5  ;;  %v665_v55 = vrot.slane %v2975_v37, 5  ;;  %v3043_v21 = vld [vmem:[%s3607_s0 + $0x50] sm:$0xf] }
  0x1f   :  { %v159_v50 = vor.u32 %v158_v31, %v155_v28  ;;  %v2118_v57 = vrot.slane %v2980_v5, 9  ;;  %v178_v29 = vrot.slane %v176_v44, 5  ;;  %v669_v0 = vrot.slane %v2995_v20, 5  ;;  %v3058_v33 = vld [vmem:[%s3607_s0 + $0x54] sm:$0x1] }
  0x20   :  { %v146_v63 = vrot.slane %v145_v41, 4  ;;  %v2119_v2 = vrot.slane %v3006_v27, 9  ;;  %v173_v10 = vor.u32 %v172_v51, %v169_v42  ;;  %v3037_v15 = vsel %vm2805_vm4, %v2117_v47, %v665_v55 }
  0x21   :  { %v160_v8 = vrot.slane %v159_v50, 4  ;;  %v673_v19 = vrot.slane %v3017_v40, 5  ;;  %v3051_v26 = vsel %vm2805_vm4, %v2118_v57, %v669_v0  ;;  %v2120_v28 = vrot.slane %v3024_v49, 9 }
  0x22   :  { %v3047_v23 = vsel %vm2864_vm7, %v146_v63, %v150_v24  ;;  %v677_v31 = vrot.slane %v3031_v59, 5  ;;  %v174_v42 = vrot.slane %v173_v10, 4  ;;  %v2182_v44 = vcombine.low %v3037_v15, %v3051_v26 }
  0x23   :  { %v3062_v41 = vcombine.low %v2938_v52, %v3047_v23  ;;  %v3066_v24 = vsel %vm2864_vm7, %v160_v8, %v164_v32  ;;  %v3072_v47 = vsel %vm2805_vm4, %v2119_v2, %v673_v19  ;;  %v181_v51 = vshrl.u32 %v3043_v21, 16 }
  0x24   :  { %v3076_v50 = vsel %vm2805_vm4, %v2120_v28, %v677_v31  ;;  %v184_v55 = vshll.u32 %v3043_v21, 16  ;;  %v3084_v32 = vsel %vm2864_vm7, %v174_v42, %v178_v29  ;;  %2437 = vmatprep.mubr.msk.bf16.mxu0 %vm318_vm1, %v2182_v44  ;;  %v190_v63 = vshll.u32 %v3058_v33, 16  ;;  %v3099_v29 = vld [vmem:[%s3607_s0 + $0x78] sm:$0xf] }
  0x25   :  { %3653 = vst [vmem:[#allocation14_spill] sm:$0xff] %v3062_v41  ;;  %2343 = vmatprep.mubr.msk.bf16.mxu1 %vm318_vm1, %v3062_v41  ;;  %v2183_v57 = vcombine.low %v3072_v47, %v3076_v50  ;;  %v195_v0 = vshrl.u32 %v2962_v60, 16  ;;  %v3093_v2 = vcombine.low %v3066_v24, %v3084_v32  ;;  %v183_v8 = vrot.slane %v181_v51, 4  ;;  %v3107_v51 = vld [vmem:[%s3607_s0 + $0x7c] sm:$0x1] }
  0x26   :  { %v186_v10 = vrot.slane %v184_v55, 5  ;;  %v198_v19 = vshll.u32 %v2962_v60, 16  ;;  %v192_v28 = vrot.slane %v190_v63, 5  ;;  %v204_v42 = vshll.u32 %v2975_v37, 16  ;;  %v3116_v37 = vld [vmem:[%s3607_s0 + $0x80] sm:$0xf] }
  0x27   :  { %3654 = vst [vmem:[#allocation15_spill] sm:$0xff] %v3093_v2  ;;  %2438 = vmatmul.mubr.msk.bf16.gmra.mrb[8].mxu0 %vm318_vm1, %v2183_v57  ;;  %v197_v31 = vrot.slane %v195_v0, 4  ;;  %v209_v44 = vshrl.u32 %v2980_v5, 16  ;;  %2344 = vmatmul.mubr.msk.bf16.gmra.mrb[4].mxu1 %vm318_vm1, %v3093_v2  ;;  %v212_v45 = vshll.u32 %v2980_v5, 16  ;;  %v218_v57 = vshll.u32 %v2995_v20, 16 }
  0x28   :  { %v187_v55 = vor.u32 %v186_v10, %v183_v8  ;;  %v200_v56 = vrot.slane %v198_v19, 5  ;;  %v3121_v63 = vld [vmem:[%s3607_s0 + $0x84] sm:$0x1]  ;;  %v206_v0 = vrot.slane %v204_v42, 5  ;;  %v223_v35 = vshrl.u32 %v3006_v27, 16 }
  0x29   :  { %v211_v14 = vrot.slane %v209_v44, 4  ;;  %v226_v8 = vshll.u32 %v3006_v27, 16  ;;  %v3128_v20 = vld [vmem:[%s3607_s0 + $0x88] sm:$0xf]  ;;  %v214_v52 = vrot.slane %v212_v45, 5  ;;  %v220_v48 = vrot.slane %v218_v57, 5 }
  0x2a   :  { %v188_v10 = vrot.slane %v187_v55, 4  ;;  %v201_v19 = vor.u32 %v200_v56, %v197_v31  ;;  %v225_v42 = vrot.slane %v223_v35, 4  ;;  %v232_v17 = vshll.u32 %v3017_v40, 16  ;;  %v3145_v45 = vld [vmem:[%s3607_s0 + $0x94] sm:$0x1] }
  0x2b   :  { %v228_v44 = vrot.slane %v226_v8, 5  ;;  %v2121_v9 = vrot.slane %v3099_v29, 9  ;;  %v215_v35 = vor.u32 %v214_v52, %v211_v14  ;;  %v681_v55 = vrot.slane %v3107_v51, 5 }
  0x2c   :  { %v193_v56 = vsel %vm2864_vm7, %v188_v10, %v192_v28  ;;  %v202_v31 = vrot.slane %v201_v19, 4  ;;  %v234_v57 = vrot.slane %v232_v17, 5  ;;  %v2122_v8 = vrot.slane %v3116_v37, 9 }
  0x2d   :  { %v229_v40 = vor.u32 %v228_v44, %v225_v42  ;;  %v685_v39 = vrot.slane %v3121_v63, 5  ;;  %v216_v25 = vrot.slane %v215_v35, 4  ;;  %v3158_v2 = vsel %vm2805_vm4, %v2121_v9, %v681_v55 }
  0x2e   :  { %v3154_v30 = vsel %vm2864_vm7, %v202_v31, %v206_v0  ;;  %v2123_v28 = vrot.slane %v3128_v20, 9  ;;  %v689_v10 = vrot.slane %v3133_v36, 5  ;;  %v2176_v9 = vrot.slane %v3140_v7, 9 }
  0x2f   :  { %3655 = vst [vmem:[#allocation16_spill] sm:$0xff] %v3154_v30  ;;  %v2080_v14 = vcombine.low %v193_v56, %v3154_v30  ;;  %v230_v52 = vrot.slane %v229_v40, 4  ;;  %v3164_v17 = vsel %vm2805_vm4, %v2122_v8, %v685_v39  ;;  %v3169_v0 = vsel %vm2864_vm7, %v216_v25, %v220_v48 }
  0x30   :  { %v2184_v19 = vcombine.low %v3158_v2, %v3164_v17  ;;  %v1199_v42 = vrot.slane %v3145_v45, 5  ;;  %v3182_v39 = vsel %vm2805_vm4, %v2123_v28, %v689_v10  ;;  %v237_v25 = vshrl.u32 %v3024_v49, 16 }
  0x31   :  { %2347 = vmatprep.mubr.msk.bf16.mxu1 %vm318_vm1, %v2080_v14  ;;  %v3178_v44 = vsel %vm2864_vm7, %v230_v52, %v234_v57  ;;  %v240_v48 = vshll.u32 %v3024_v49, 16  ;;  %v246_v35 = vshll.u32 %v3031_v59, 16  ;;  %v251_v55 = vshrl.u32 %v3099_v29, 16 }
  0x32   :  { %3656 = vst [vmem:[#allocation17_spill] sm:$0xff] %v3178_v44  ;;  %v3188_v56 = vcombine.low %v3169_v0, %v3178_v44  ;;  %2441 = vmatprep.mubr.msk.bf16.mxu0 %vm318_vm1, %v2184_v19  ;;  %v3193_v31 = vsel %vm2805_vm4, %v2176_v9, %v1199_v42  ;;  %v239_v57 = vrot.slane %v237_v25, 4  ;;  %v254_v28 = vshll.u32 %v3099_v29, 16 }
  0x33   :  { %3658 = vst [vmem:[#allocation19_spill] sm:$0xff] %v3193_v31  ;;  %v2185_v40 = vcombine.low %v3182_v39, %v3193_v31  ;;  %v242_v8 = vrot.slane %v240_v48, 5  ;;  %v248_v14 = vrot.slane %v246_v35, 5  ;;  %v253_v52 = vrot.slane %v251_v55, 4 }
  0x34   :  { %3657 = vst [vmem:[#allocation18_spill] sm:$0xff] %v3188_v56  ;;  %2348 = vmatmul.mubr.msk.bf16.gmra.mrb[8].mxu1 %vm318_vm1, %v3188_v56  ;;  %v260_v10 = vshll.u32 %v3107_v51, 16  ;;  %v265_v19 = vshrl.u32 %v3116_v37, 16  ;;  %v256_v9 = vrot.slane %v254_v28, 5  ;;  %v268_v42 = vshll.u32 %v3116_v37, 16 }
  0x35   :  { %2442 = vmatmul.mubr.msk.bf16.gmra.mrb[12].mxu0 %vm318_vm1, %v2185_v40  ;;  %v243_v59 = vor.u32 %v242_v8, %v239_v57  ;;  %v274_v25 = vshll.u32 %v3121_v63, 16  ;;  %v279_v41 = vshrl.u32 %v3128_v20, 16  ;;  %v282_v53 = vshll.u32 %v3128_v20, 16 }
  0x36   :  { %v267_v48 = vrot.slane %v265_v19, 4  ;;  %2447 = vmatprep.mubr.msk.bf16.mxu0 %vm318_vm1, %v2798_v13  ;;  %v257_v51 = vor.u32 %v256_v9, %v253_v52  ;;  %v262_v55 = vrot.slane %v260_v10, 5  ;;  %v270_v56 = vrot.slane %v268_v42, 5 }
  0x37   :  { %v244_v35 = vrot.slane %v243_v59, 4  ;;  %v276_v31 = vrot.slane %v274_v25, 5  ;;  %v281_v40 = vrot.slane %v279_v41, 4  ;;  %v284_v57 = vrot.slane %v282_v53, 5 }
  0x38   :  { %v288_v8 = vshll.u32 %v3133_v36, 16  ;;  %v258_v28 = vrot.slane %v257_v51, 4  ;;  %v271_v19 = vor.u32 %v270_v56, %v267_v48  ;;  %v3218_v44 = vcombine.low %v2789_v11, %v2873_v3  ;;  %v3227_v36 = vld [vmem:[%s3607_s0 + $0x48] sm:$0xf] }
  0x39   :  { %v3214_v63 = vsel %vm2864_vm7, %v244_v35, %v248_v14  ;;  %v285_v30 = vor.u32 %v284_v57, %v281_v40  ;;  %v3222_v52 = vcombine.low %v2883_v22, %v2894_v12  ;;  %v1484_v56 = vshrl.u32 %v3227_v36, 16  ;;  %v3252_v35 = vld [vmem:[%s3606_s1 + $0x20] sm:$0xf] }
  0x3a   :  { %v290_v59 = vrot.slane %v288_v8, 5  ;;  %v3231_v53 = vsel %vm2864_vm7, %v258_v28, %v262_v55  ;;  %v272_v41 = vrot.slane %v271_v19, 4  ;;  %v1487_v9 = vshll.u32 %v3227_v36, 16  ;;  %3661 = vst [vmem:[#allocation22_spill] sm:$0xff] %v3252_v35  ;;  %v3278_v55 = vld [vmem:[%s3607_s0 + $0x98] sm:$0xf] }
  0x3b   :  { %3659 = vst [vmem:[#allocation20_spill] sm:$0xff] %v3222_v52  ;;  %v3236_v14 = vcombine.low %v3214_v63, %v3231_v53  ;;  %v286_v10 = vrot.slane %v285_v30, 4  ;;  %v1524_v42 = vsel %vm343_vm0, %v3000_v16, 0  ;;  %v2092_v48 = vcombine.low %v2754_v1, %v2764_v4  ;;  %v3257_v30 = vld [vmem:[%s3607_s0 + $0x4c] sm:$0x1] }
  0x3c   :  { %v3243_v25 = vsel %vm2864_vm7, %v272_v41, %v276_v31  ;;  %v742_v1 = vsel %vm343_vm0, %v2985_v6, 0  ;;  %v2195_v31 = vcombine.low %v2909_v34, %v3227_v36  ;;  %v3273_v51 = vcombine.low %v2980_v5, %v3006_v27 }
  0x3d   :  { %3660 = vst [vmem:[#allocation21_spill] sm:$0xff] %v3236_v14  ;;  %2448 = vmatmul.mubr.msk.bf16.vlgmr.msra.gmra.mrb[0].mxu0 %vm318_vm1, %v3218_v44  ;;  %2351 = vmatprep.mubr.msk.bf16.mxu1 %vm318_vm1, %v3236_v14  ;;  %v3263_v16 = vsel %vm2864_vm7, %v286_v10, %v290_v59  ;;  %v1498_v6 = vshrl.u32 %v3278_v55, 16  ;;  %v1012_v57 = vshrl.u32 %v2909_v34, 16  ;;  %v1015_v8 = vshll.u32 %v2909_v34, 16 }
  0x3e   :  { %2451 = vmatprep.mubr.msk.bf16.mxu0 %vm318_vm1, %v3222_v52  ;;  %v3282_v40 = vcombine.low %v3243_v25, %v3263_v16  ;;  %2464 = vmatpush3.bf16.msra.mxu0 %v1524_v42  ;;  %v1021_v28 = vshll.u32 %v2920_v43, 16  ;;  %v1486_v19 = vrot.slane %v1484_v56, 4  ;;  %v1489_v59 = vrot.slane %v1487_v9, 5 }
  0x3f   :  { %2685 = vmatprep.subr.msk.bf16.mxu0 %vm343_vm0, %v3252_v35  ;;  %v1493_v41 = vshll.u32 %v3257_v30, 16  ;;  %v1501_v10 = vshll.u32 %v3278_v55, 16  ;;  %v1014_v42 = vrot.slane %v1012_v57, 4  ;;  %v1017_v11 = vrot.slane %v1015_v8, 5 }
  0x40   :  { %3662 = vst [vmem:[#allocation23_spill] sm:$0xff] %v3282_v40  ;;  %2352 = vmatmul.mubr.msk.bf16.gmra.mrb[12].mxu1 %vm318_vm1, %v3282_v40  ;;  %v3296_v4 = vcombine.low %v2844_v38, %v2926_v46  ;;  %v1023_v14 = vrot.slane %v1021_v28, 5  ;;  %v1490_v35 = vor.u32 %v1489_v59, %v1486_v19  ;;  %v3301_v56 = vcombine.low %v2946_v54, %v2955_v58  ;;  %v63_v46 = vld [vmem:[%s3607_s0 + $0x9c] sm:$0x1] }
  0x41   :  { %2357 = vmatprep.mubr.msk.bf16.mxu1 %vm318_vm1, %v2092_v48  ;;  %v1495_v43 = vrot.slane %v1493_v41, 5  ;;  %v1018_v9 = vor.u32 %v1017_v11, %v1014_v42  ;;  %v2116_v40 = vrot.slane %v3043_v21, 9  ;;  %v661_v52 = vrot.slane %v3058_v33, 5 }
  0x42   :  { %v3307_v57 = vcombine.low %v3051_v26, %v3072_v47  ;;  %v1491_v38 = vrot.slane %v1490_v35, 4  ;;  %v1026_v48 = vshrl.u32 %v3140_v7, 16  ;;  %v1029_v8 = vshll.u32 %v3140_v7, 16 }
  0x43   :  { %v1035_v54 = vshll.u32 %v3145_v45, 16  ;;  %v1019_v11 = vrot.slane %v1018_v9, 4  ;;  %v3318_v58 = vsel %vm2805_vm4, %v2116_v40, %v661_v52  ;;  %v1500_v26 = vrot.slane %v1498_v6, 4  ;;  %v2141_v6 = vld [vmem:[%s3606_s1 + $0xc] sm:$0xf] }
  0x44   :  { %v1503_v33 = vrot.slane %v1501_v10, 5  ;;  %v1496_v47 = vsel %vm2864_vm7, %v1491_v38, %v1495_v43  ;;  %v2129_v35 = vcombine.low %v3318_v58, %v3037_v15  ;;  %v1028_v28 = vrot.slane %v1026_v48, 4  ;;  %v3678_v15 = vld [vmem:[#allocation2_spill] sm:$0xff]  ;;  %v3679_v58 = vld [vmem:[#allocation3_spill] sm:$0xff] }
  0x45   :  { %2452 = vmatmul.mubr.msk.bf16.gmra.mrb[4].mxu0 %vm318_vm1, %v2195_v31  ;;  %v1031_v45 = vrot.slane %v1029_v8, 5  ;;  %v3328_v31 = vsel %vm2864_vm7, %v1019_v11, %v1023_v14  ;;  %v1037_v19 = vrot.slane %v1035_v54, 5  ;;  %v1507_v40 = vshll.u32 %v63_v46, 16 }
  0x46   :  { %2455 = vmatprep.mubr.msk.bf16.mxu0 %vm318_vm1, %v3273_v51  ;;  %v1504_v52 = vor.u32 %v1503_v33, %v1500_v26  ;;  %v2206_v59 = vcombine.low %v3328_v31, %v1496_v47  ;;  %v3336_v10 = vcombine.low %v3076_v50, %v3158_v2  ;;  %v3340_v42 = vcombine.low %v3164_v17, %v3182_v39 }
  0x47   :  { %v1032_v41 = vor.u32 %v1031_v45, %v1028_v28  ;;  %v2098_v14 = vcombine.low %v3024_v49, %v3099_v29  ;;  %v1509_v9 = vrot.slane %v1507_v40, 5  ;;  %v2099_v50 = vcombine.low %v3116_v37, %v3128_v20  ;;  %v3663_v45 = vld [vmem:[#allocation16_spill] sm:$0xff]  ;;  %v3665_v40 = vld [vmem:[#allocation19_spill] sm:$0xff] }
  0x48   :  { %2358 = vmatmul.mubr.msk.bf16.vlgmr.msra.gmra.mrb[0].mxu1 %vm318_vm1, %v2798_v13  ;;  %v1505_v43 = vrot.slane %v1504_v52, 4  ;;  %v2216_v38 = vrot.slane %v3227_v36, 9  ;;  %v1643_v17 = vrot.slane %v3257_v30, 5  ;;  %v2144_v39 = vcombine.low %v2873_v3, %v2883_v22  ;;  %v2705_v3 = vld [vmem:[%s3608_s3] sm:$0xff]   ;;  %v2706_v22 = vld [vmem:[%s3608_s3 + $0x8] sm:$0xff]  }
  0x49   :  { %2374 = vmatpush3.bf16.msra.mxu1 %v742_v1  ;;  %2361 = vmatprep.mubr.msk.bf16.mxu1 %vm318_vm1, %v3218_v44  ;;  %v1033_v2 = vrot.slane %v1032_v41, 4  ;;  %v2145_v1 = vcombine.low %v2894_v12, %v2909_v34  ;;  %v2146_v30 = vcombine.low %v2962_v60, %v2980_v5  ;;  %v2147_v48 = vcombine.low %v3006_v27, %v3024_v49  ;;  %v2707_v12 = vld [vmem:[%s3608_s3 + $0x10] sm:$0xff]   ;;  %v2708_v34 = vld [vmem:[%s3608_s3 + $0x18] sm:$0xff]   ;;  %v3684_v5 = vld [vmem:[#allocation10_spill] sm:$0xff] }
  0x4a   :  { %2680 = vmatprep.subr.msk.bf16.mxu1 %vm343_vm0, %v2141_v6  ;;  %v1510_v13 = vsel %vm2864_vm7, %v1505_v43, %v1509_v9  ;;  %v1644_v36 = vsel %vm2805_vm4, %v2216_v38, %v1643_v17  ;;  %v2217_v11 = vrot.slane %v3278_v55, 9  ;;  %v1647_v61 = vrot.slane %v63_v46, 5  ;;  %v3667_v38 = vld [vmem:[#allocation13_spill] sm:$0xff]  ;;  %v3668_v17 = vld [vmem:[#allocation22_spill] sm:$0xff] }
  0x4b   :  { %v3361_v44 = vsel %vm2864_vm7, %v1033_v2, %v1037_v19  ;;  %v2219_v54 = vcombine.low %v2968_v62, %v1644_v36  ;;  %v2096_v26 = vcombine.low %v3043_v21, %v2962_v60  ;;  %v2148_v33 = vcombine.low %v3099_v29, %v3116_v37  ;;  %v3664_v19 = vld [vmem:[#allocation17_spill] sm:$0xff]  ;;  %v3666_v2 = vld [vmem:[#allocation20_spill] sm:$0xff]  ;;  %v1816_v36 = vld [vmem:[%s3609_s4] sm:$0x3] }
  0x4c   :  { %v2207_v8 = vcombine.low %v3361_v44, %v1510_v13  ;;  %v2149_v47 = vcombine.low %v3128_v20, %v3140_v7  ;;  %v2161_v28 = vcombine.low %v3047_v23, %v3066_v24  ;;  %v1648_v62 = vsel %vm2805_vm4, %v2217_v11, %v1647_v61  ;;  %v3670_v11 = vld [vmem:[#allocation15_spill] sm:$0xff]  ;;  %v3683_v60 = vld [vmem:[#allocation9_spill] sm:$0xff]  ;;  %v2709_v49 = vld [vmem:[%s3608_s3 + $0x20] sm:$0xff]  }
  0x4d   :  { %2456 = vmatmul.mubr.msk.bf16.gmra.mrb[8].mxu0 %vm318_vm1, %v2098_v14  ;;  %v2162_v46 = vcombine.low %v3084_v32, %v3328_v31  ;;  %v2163_v21 = vcombine.low %v3663_v45, %v3169_v0  ;;  %v2164_v52 = vcombine.low %v3664_v19, %v3214_v63  ;;  %v2220_v41 = vcombine.low %v3665_v40, %v1648_v62  ;;  %v2158_v40 = vld [vmem:[%s3606_s1 + $0x10] sm:$0xf]  ;;  %v2710_v20 = vld [vmem:[%s3608_s3 + $0x28] sm:$0xff]   ;;  %v3564_v63 = vld [vmem:[%s3610_s2] ss:$0 sm:$0xff] }
  0x4e   :  { %2459 = vmatprep.mubr.msk.bf16.mxu0 %vm318_vm1, %v2099_v50  ;;  %v2165_v43 = vcombine.low %v3231_v53, %v3243_v25  ;;  %v2166_v9 = vcombine.low %v3263_v16, %v3361_v44  ;;  %v2196_v18 = vcombine.low %v3140_v7, %v3278_v55  ;;  %v1662_v13 = vsel %vm343_vm0, %v3668_v17, 0  ;;  %v3669_v55 = vld [vmem:[#allocation14_spill] sm:$0xff]  ;;  %v3686_v7 = vld [vmem:[#allocation11_spill] sm:$0xff]  ;;  %v3687_v29 = vld [vmem:[#allocation12_spill] sm:$0xff] }
  0x4f   :  { %vm1882_vm8 = vcmask 1041408   ;;  %v896_v62 = vsel %vm343_vm0, %v2141_v6, 0  ;;  %vm1857_vm9 = vcmask 31744   ;;  %v3685_v27 = vcombine.low %v3683_v60, %v3684_v5 }
  0x50   :  { %2362 = vmatmul.mubr.msk.bf16.gmra.mrb[4].mxu1 %vm318_vm1, %v3666_v2  ;;  %v3675_v2 = vld [vmem:[#allocation8_spill] sm:$0xff]  ;;  %v1884_v6 = vsel %vm1882_vm8, %v1816_v36, 0  ;;  %v3688_v37 = vcombine.low %v3686_v7, %v3687_v29 }
  0x51   :  { %2365 = vmatprep.mubr.msk.bf16.mxu1 %vm318_vm1, %v2096_v26  ;;  %v3674_v26 = vld [vmem:[#allocation18_spill] sm:$0xff] }
  0x55   :  { %2460 = vmatmul.mubr.msk.bf16.gmra.mrb[12].mxu0 %vm318_vm1, %v2196_v18  ;;  %v3682_v18 = vld [vmem:[#allocation4_spill] sm:$0xff] }
  0x56   :  { %2465 = vmatprep.mubr.msk.bf16.mxu0 %vm318_vm1, %v3667_v38 }
  0x58   :  { %2366 = vmatmul.mubr.msk.bf16.gmra.mrb[8].mxu1 %vm318_vm1, %v3273_v51  ;;  %v3671_v51 = vld [vmem:[#allocation6_spill] sm:$0xff] }
  0x59   :  { %2369 = vmatprep.mubr.msk.bf16.mxu1 %vm318_vm1, %v2098_v14  ;;  %v3672_v14 = vld [vmem:[#allocation7_spill] sm:$0xff] }
  0x5a   :  { %v3673_v61 = vcombine.low %v3671_v51, %v3672_v14 }
  0x5d   :  { %2466 = vmatmul.mubr.msk.bf16.vlgmr.msra.gmra.mrb[0].mxu0 %vm318_vm1, %v3669_v55 }
  0x5e   :  { %2469 = vmatprep.mubr.msk.bf16.mxu0 %vm318_vm1, %v3670_v11  ;;  %2482 = vmatpush3.bf16.msra.mxu0 %v1662_v13 }
  0x5f   :  { %2686 = vmatprep.subr.msk.bf16.mxu0 %vm1882_vm8, %v1816_v36 }
  0x60   :  { %2370 = vmatmul.mubr.msk.bf16.gmra.mrb[12].mxu1 %vm318_vm1, %v2099_v50  ;;  %v3676_v50 = vld [vmem:[#allocation21_spill] sm:$0xff] }
  0x61   :  { %2375 = vmatprep.mubr.msk.bf16.mxu1 %vm318_vm1, %v3673_v61 }
  0x65   :  { %2470 = vmatmul.mubr.msk.bf16.gmra.mrb[4].mxu0 %vm318_vm1, %v2206_v59  ;;  %v3677_v59 = vld [vmem:[#allocation23_spill] sm:$0xff] }
  0x66   :  { %2473 = vmatprep.mubr.msk.bf16.mxu0 %vm318_vm1, %v3674_v26 }
  0x68   :  { %2376 = vmatmul.mubr.msk.bf16.vlgmr.msra.gmra.mrb[0].mxu1 %vm318_vm1, %v3675_v2 }
  0x69   :  { %2392 = vmatpush3.bf16.msra.mxu1 %v896_v62  ;;  %2379 = vmatprep.mubr.msk.bf16.mxu1 %vm318_vm1, %v3296_v4 }
  0x6a   :  { %2681 = vmatprep.subr.msk.bf16.mxu1 %vm343_vm0, %v2158_v40 }
  0x6d   :  { %2474 = vmatmul.mubr.msk.bf16.gmra.mrb[8].mxu0 %vm318_vm1, %v3676_v50 }
  0x6e   :  { %2477 = vmatprep.mubr.msk.bf16.mxu0 %vm318_vm1, %v3677_v59 }
  0x70   :  { %2380 = vmatmul.mubr.msk.bf16.gmra.mrb[4].mxu1 %vm318_vm1, %v3301_v56 }
  0x71   :  { %2383 = vmatprep.mubr.msk.bf16.mxu1 %vm318_vm1, %v2129_v35  ;;  %v3680_v35 = vcombine.low %v3678_v15, %v3679_v58 }
  0x75   :  { %2478 = vmatmul.mubr.msk.bf16.gmra.mrb[12].mxu0 %vm318_vm1, %v2207_v8  ;;  %v3681_v8 = vld [vmem:[#allocation5_spill] sm:$0xff] }
  0x76   :  { %2483 = vmatprep.mubr.msk.bf16.mxu0 %vm318_vm1, %v3675_v2  ;;  %v2143_v38 = vcombine.low %v3682_v18, %v3681_v8 }
  0x78   :  { %2384 = vmatmul.mubr.msk.bf16.gmra.mrb[8].mxu1 %vm318_vm1, %v3307_v57 }
  0x79   :  { %2387 = vmatprep.mubr.msk.bf16.mxu1 %vm318_vm1, %v3336_v10 }
  0x7d   :  { %2484 = vmatmul.mubr.msk.bf16.vlgmr.msra.gmra.mrb[0].mxu0 %vm318_vm1, %v3296_v4  ;;  %v1076_v4 = vsel %vm343_vm0, %v2158_v40, 0 }
  0x7e   :  { %2487 = vmatprep.mubr.msk.bf16.mxu0 %vm318_vm1, %v3301_v56  ;;  %2500 = vmatpush3.bf16.msra.mxu0 %v1884_v6  ;;  %v2711_v56 = vld [vmem:[%s3608_s3 + $0x30] sm:$0xff]  }
  0x80   :  { %2388 = vmatmul.mubr.msk.bf16.gmra.mrb[12].mxu1 %vm318_vm1, %v3340_v42 }
  0x81   :  { %2393 = vmatprep.mubr.msk.bf16.mxu1 %vm318_vm1, %v3680_v35 }
  0x85   :  { %2488 = vmatmul.mubr.msk.bf16.gmra.mrb[4].mxu0 %vm318_vm1, %v2219_v54 }
  0x86   :  { %2491 = vmatprep.mubr.msk.bf16.mxu0 %vm318_vm1, %v3307_v57  ;;  %v2712_v57 = vld [vmem:[%s3608_s3 + $0x38] sm:$0xff]  }
  0x88   :  { %2394 = vmatmul.mubr.msk.bf16.vlgmr.msra.gmra.mrb[0].mxu1 %vm318_vm1, %v2143_v38 }
  0x89   :  { %2410 = vmatpush3.bf16.msra.mxu1 %v1076_v4  ;;  %2397 = vmatprep.mubr.msk.bf16.mxu1 %vm318_vm1, %v2144_v39 }
  0x8d   :  { %2492 = vmatmul.mubr.msk.bf16.gmra.mrb[8].mxu0 %vm318_vm1, %v3336_v10 }
  0x8e   :  { %2495 = vmatprep.mubr.msk.bf16.mxu0 %vm318_vm1, %v3340_v42 }
  0x90   :  { %2398 = vmatmul.mubr.msk.bf16.gmra.mrb[4].mxu1 %vm318_vm1, %v2145_v1 }
  0x91   :  { %2401 = vmatprep.mubr.msk.bf16.mxu1 %vm318_vm1, %v2146_v30 }
  0x95   :  { %2496 = vmatmul.mubr.msk.bf16.gmra.mrb[12].mxu0 %vm318_vm1, %v2220_v41 }
  0x96   :  { %2501 = vmatprep.mubr.msk.bf16.mxu0 %vm1857_vm9, %v2705_v3 }
  0x98   :  { %2402 = vmatmul.mubr.msk.bf16.gmra.mrb[8].mxu1 %vm318_vm1, %v2147_v48 }
  0x99   :  { %2405 = vmatprep.mubr.msk.bf16.mxu1 %vm318_vm1, %v2148_v33  ;;  %v3572_v33 = vld [vmem:[%s3611_s5] ss:$0 sm:$0xff] }
  0x9d   :  { %2502 = vmatmul.mubr.msk.bf16.vlgmr.msra.gmra.mrb[0].mxu0 %vm1857_vm9, %v2706_v22 }
  0x9e   :  { %2505 = vmatprep.mubr.msk.bf16.mxu0 %vm1857_vm9, %v2707_v12 }
  0xa0   :  { %2406 = vmatmul.mubr.msk.bf16.gmra.mrb[12].mxu1 %vm318_vm1, %v2149_v47 }
  0xa1   :  { %2411 = vmatprep.mubr.msk.bf16.mxu1 %vm318_vm1, %v3685_v27 }
  0xa5   :  { %2506 = vmatmul.mubr.msk.bf16.gmra.mrb[4].mxu0 %vm1857_vm9, %v2708_v34 }
  0xa6   :  { %2509 = vmatprep.mubr.msk.bf16.mxu0 %vm1857_vm9, %v2709_v49 }
  0xa8   :  { %2412 = vmatmul.mubr.msk.bf16.vlgmr.msra.gmra.mrb[0].mxu1 %vm318_vm1, %v3688_v37 }
  0xa9   :  { %2415 = vmatprep.mubr.msk.bf16.mxu1 %vm318_vm1, %v2161_v28 }
  0xad   :  { %2510 = vmatmul.mubr.msk.bf16.gmra.mrb[8].mxu0 %vm1857_vm9, %v2710_v20 }
  0xae   :  { %2513 = vmatprep.mubr.msk.bf16.mxu0 %vm1857_vm9, %v2711_v56 }
  0xb0   :  { %2416 = vmatmul.mubr.msk.bf16.gmra.mrb[4].mxu1 %vm318_vm1, %v2162_v46 }
  0xb1   :  { %2419 = vmatprep.mubr.msk.bf16.mxu1 %vm318_vm1, %v2163_v21 }
  0xb5   :  { %2514 = vmatmul.mubr.msk.bf16.gmra.mrb[12].mxu0 %vm1857_vm9, %v2712_v57 }
  0xb8   :  { %2420 = vmatmul.mubr.msk.bf16.gmra.mrb[8].mxu1 %vm318_vm1, %v2164_v52 }
  0xb9   :  { %2423 = vmatprep.mubr.msk.bf16.mxu1 %vm318_vm1, %v2165_v43 }
  0xc0   :  { %2424 = vmatmul.mubr.msk.bf16.gmra.mrb[12].mxu1 %vm318_vm1, %v2166_v9 }
 0x170   :  { %v2503_v23 = vpop.f32.mrb[0].mxu0 }
 0x171   :  { %v1920_v24 = vpop.f32.mrb[1].mxu0 }
 0x172   :  { %v2504_v32 = vpop.f32.mrb[2].mxu0 }
 0x173   :  { %v1923_v0 = vpop.f32.mrb[3].mxu0 }
 0x178   :  { %v2507_v31 = vpop.f32.mrb[4].mxu0 }
 0x179   :  { %v1936_v10 = vpop.f32.mrb[5].mxu0 }
 0x17a   :  { %v2508_v42 = vpop.f32.mrb[6].mxu0 }
 0x17b   :  { %v1939_v53 = vpop.f32.mrb[7].mxu0  ;;  %v2413_v25 = vpop.f32.mrb[0].mxu1 }
 0x17c   :  { %v2517_v39 = vadd.f32 %v2413_v25, %v3564_v63  ;;  %v1112_v1 = vpop.f32.mrb[1].mxu1 }
 0x17d   :  { %v2519_v16 = vadd.f32 %v3564_v63, %v1112_v1  ;;  %v2414_v44 = vpop.f32.mrb[2].mxu1 }
 0x17e   :  { %v2518_v30 = vadd.f32 %v2517_v39, %v2503_v23  ;;  %v2521_v48 = vadd.f32 %v2414_v44, %v3564_v63  ;;  %v1115_v54 = vpop.f32.mrb[3].mxu1 }
 0x17f   :  { %v2523_v47 = vadd.f32 %v3564_v63, %v1115_v54  ;;  %v2520_v46 = vadd.f32 %v2519_v16, %v1920_v24 }
 0x180   :  { %v2511_v28 = vpop.f32.mrb[8].mxu0  ;;  %v2522_v45 = vadd.f32 %v2521_v48, %v2504_v32  ;;  %v2008_v59 = vadd.f32 %v2518_v30, %v3572_v33 }
 0x181   :  { %v1952_v21 = vpop.f32.mrb[9].mxu0  ;;  %v2524_v19 = vadd.f32 %v2523_v47, %v1923_v0  ;;  %v2006_v52 = vadd.f32 %v2520_v46, %v3572_v33 }
 0x182   :  { %v2512_v41 = vpop.f32.mrb[10].mxu0  ;;  %v2024_v38 = vmax.f32 %v2008_v59, 0.0  ;;  %v2009_v4 = vadd.f32 %v2522_v45, %v3572_v33 }
 0x183   :  { %v1955_v43 = vpop.f32.mrb[11].mxu0  ;;  %v2417_v9 = vpop.f32.mrb[4].mxu1  ;;  %v2022_v17 = vmax.f32 %v2006_v52, 0.0  ;;  %v2007_v13 = vadd.f32 %v2524_v19, %v3572_v33 }
 0x184   :  { %v2525_v36 = vadd.f32 %v2417_v9, %v3564_v63  ;;  %v1128_v55 = vpop.f32.mrb[5].mxu1  ;;  %v2025_v29 = vmax.f32 %v2009_v4, 0.0 }
 0x185   :  { %v2527_v11 = vadd.f32 %v3564_v63, %v1128_v55  ;;  %v2418_v51 = vpop.f32.mrb[6].mxu1  ;;  %2038 = vxpose.xlu0.b32.start [1/16] (narrow) %v2022_v17, 8  ;;  %v2023_v2 = vmax.f32 %v2007_v13, 0.0 }
 0x186   :  { %v2526_v14 = vadd.f32 %v2525_v36, %v2507_v31  ;;  %v2529_v61 = vadd.f32 %v2418_v51, %v3564_v63  ;;  %v1131_v26 = vpop.f32.mrb[7].mxu1 }
 0x187   :  { %v2528_v62 = vadd.f32 %v2527_v11, %v1936_v10  ;;  %v2531_v40 = vadd.f32 %v3564_v63, %v1131_v26 }
 0x188   :  { %v2515_v50 = vpop.f32.mrb[12].mxu0  ;;  %v2530_v6 = vadd.f32 %v2529_v61, %v2508_v42  ;;  %v2012_v44 = vadd.f32 %v2526_v14, %v3572_v33 }
 0x189   :  { %v1968_v15 = vpop.f32.mrb[13].mxu0  ;;  %v2532_v58 = vadd.f32 %v2531_v40, %v1939_v53  ;;  %2039 = vxpose.xlu0.b32.cont [2/16] (narrow) %v2023_v2, 8  ;;  %v2010_v37 = vadd.f32 %v2528_v62, %v3572_v33 }
 0x18a   :  { %v2516_v35 = vpop.f32.mrb[14].mxu0  ;;  %v2028_v54 = vmax.f32 %v2012_v44, 0.0  ;;  %v2013_v47 = vadd.f32 %v2530_v6, %v3572_v33 }
 0x18b   :  { %v1971_v8 = vpop.f32.mrb[15].mxu0  ;;  %v2421_v18 = vpop.f32.mrb[8].mxu1  ;;  %v2026_v23 = vmax.f32 %v2010_v37, 0.0  ;;  %v2011_v24 = vadd.f32 %v2532_v58, %v3572_v33 }
 0x18c   :  { %v2533_v3 = vadd.f32 %v2421_v18, %v3564_v63  ;;  %v1144_v22 = vpop.f32.mrb[9].mxu1 }
 0x18d   :  { %v2535_v12 = vadd.f32 %v3564_v63, %v1144_v22  ;;  %v2422_v34 = vpop.f32.mrb[10].mxu1  ;;  %2040 = vxpose.xlu0.b32.cont [3/16] (narrow) %v2024_v38, 8  ;;  %v2027_v16 = vmax.f32 %v2011_v24, 0.0 }
 0x18e   :  { %v2534_v60 = vadd.f32 %v2533_v3, %v2511_v28  ;;  %v2537_v5 = vadd.f32 %v2422_v34, %v3564_v63  ;;  %v1147_v27 = vpop.f32.mrb[11].mxu1  ;;  %v2029_v28 = vmax.f32 %v2013_v47, 0.0 }
 0x18f   :  { %v2536_v49 = vadd.f32 %v2535_v12, %v1952_v21  ;;  %v2539_v7 = vadd.f32 %v3564_v63, %v1147_v27 }
 0x190   :  { %v2538_v20 = vadd.f32 %v2537_v5, %v2512_v41 }
 0x191   :  { %v2540_v56 = vadd.f32 %v2539_v7, %v1955_v43  ;;  %2041 = vxpose.xlu0.b32.cont [4/16] (narrow) %v2025_v29, 8  ;;  %v2014_v46 = vadd.f32 %v2536_v49, %v3572_v33 }
 0x192   :  { %v2017_v41 = vadd.f32 %v2538_v20, %v3572_v33 }
 0x193   :  { %v2425_v57 = vpop.f32.mrb[12].mxu1  ;;  %v2030_v45 = vmax.f32 %v2014_v46, 0.0  ;;  %v2015_v21 = vadd.f32 %v2540_v56, %v3572_v33 }
 0x194   :  { %v2541_v32 = vadd.f32 %v2425_v57, %v3564_v63  ;;  %v1160_v0 = vpop.f32.mrb[13].mxu1  ;;  %v2033_v43 = vmax.f32 %v2017_v41, 0.0 }
 0x195   :  { %v2543_v31 = vadd.f32 %v3564_v63, %v1160_v0  ;;  %v2426_v10 = vpop.f32.mrb[14].mxu1  ;;  %2042 = vxpose.xlu0.b32.cont [5/16] (narrow) %v2026_v23, 8  ;;  %v2031_v19 = vmax.f32 %v2015_v21, 0.0 }
 0x196   :  { %v2542_v42 = vadd.f32 %v2541_v32, %v2515_v50  ;;  %v2545_v53 = vadd.f32 %v2426_v10, %v3564_v63  ;;  %v1163_v25 = vpop.f32.mrb[15].mxu1 }
 0x197   :  { %v2544_v39 = vadd.f32 %v2543_v31, %v1968_v15  ;;  %v2547_v1 = vadd.f32 %v3564_v63, %v1163_v25  ;;  %v2016_v63 = vadd.f32 %v2534_v60, %v3572_v33 }
 0x198   :  { %v2546_v30 = vadd.f32 %v2545_v53, %v2516_v35  ;;  %v2020_v55 = vadd.f32 %v2542_v42, %v3572_v33 }
 0x199   :  { %v2548_v48 = vadd.f32 %v2547_v1, %v1971_v8  ;;  %2043 = vxpose.xlu0.b32.cont [6/16] (narrow) %v2027_v16, 8  ;;  %v2032_v52 = vmax.f32 %v2016_v63, 0.0  ;;  %v2018_v9 = vadd.f32 %v2544_v39, %v3572_v33 }
 0x19a   :  { %v2036_v11 = vmax.f32 %v2020_v55, 0.0  ;;  %v2021_v51 = vadd.f32 %v2546_v30, %v3572_v33 }
 0x19b   :  { %v2034_v17 = vmax.f32 %v2018_v9, 0.0  ;;  %v2019_v13 = vadd.f32 %v2548_v48, %v3572_v33 }
 0x19c   :  { %v2037_v14 = vmax.f32 %v2021_v51, 0.0 }
 0x19d   :  { %2044 = vxpose.xlu0.b32.cont [7/16] (narrow) %v2028_v54, 8  ;;  %v2035_v36 = vmax.f32 %v2019_v13, 0.0 }
 0x1a1   :  { %2045 = vxpose.xlu0.b32.cont [8/16] (narrow) %v2029_v28, 8 }
 0x1a5   :  { %2046 = vxpose.xlu0.b32.cont [9/16] (narrow) %v2030_v45, 8 }
 0x1a9   :  { %2047 = vxpose.xlu0.b32.cont [10/16] (narrow) %v2031_v19, 8 }
 0x1ad   :  { %2048 = vxpose.xlu0.b32.cont [11/16] (narrow) %v2032_v52, 8 }
 0x1b1   :  { %2049 = vxpose.xlu0.b32.cont [12/16] (narrow) %v2033_v43, 8 }
 0x1b5   :  { %2050 = vxpose.xlu0.b32.cont [13/16] (narrow) %v2034_v17, 8 }
 0x1b9   :  { %2051 = vxpose.xlu0.b32.cont [14/16] (narrow) %v2035_v36, 8 }
 0x1bd   :  { %2052 = vxpose.xlu0.b32.cont [15/16] (narrow) %v2036_v11, 8 }
 0x1c1   :  { %2053 = vxpose.xlu0.b32.end [16/16] (narrow) %v2037_v14, 8 }
 0x205   :  { %v2054_v61 = vpop.trf.xlu0 }
 0x206   :  { %2070 = vst [vmem:[%s3612_s6] sm:$0xff] %v2054_v61 }

</bundles_post_ra>
